<compile_context>
chip_gen: v7x
topology: tpu7x:2x2x1
jax: 0.10.0
libtpu: 0.0.40
codegen_flags: <defaults>
</compile_context>

<pallas_src>
import math

import jax
import jax.numpy as jnp
import numpy as np
from jax.experimental import pallas as pl
from jax.experimental.pallas import tpu as pltpu

KAPPA = 20.0
EPS = 1e-6


def _make_em_kernel(stage_num: int, bt: int, c: int, n_pad: int, n_valid: int, k: int):
    """EM iteration kernel for a tile of `bt` batch elements.

    x_ref    : (bt, c, n_pad)  bf16 features (flattened spatial), zero-padded in n
    xt_ref   : (bt, n_pad, c)  bf16 pre-transposed features (same data)
    mu0_ref  : (k, c)          f32 initial (l2-normalized) prototype bases
    mu_out   : (bt, k, c)      f32 final prototypes (== torch mu.permute(0,2,1))
    z_out    : (bt, k, n_pad)  f32 final responsibilities, lane-dense layout
    """
    pad_cols = n_pad - n_valid
    # Padded spatial columns of x are zero, so their k-softmax value is exactly
    # 1/k; subtract their total contribution pad_cols/k from the spatial sum
    # instead of masking a (bt,k,n_pad) tensor every stage.  Invariant: x's
    # padded columns are zero (they never reach mu) and the wrapper slices
    # z[:, :, :n_valid].
    pad_corr = float(pad_cols) / float(k)

    def em_kernel(x_ref, xt_ref, mu0_ref, mu_out_ref, z_out_ref):
        x = x_ref[...]                                               # (bt, c, n) bf16
        xt = xt_ref[...]                                             # (bt, n, c) bf16
        mu = jnp.broadcast_to(mu0_ref[...][None, :, :], (bt, k, c))  # (bt, k, c) f32

        def stage(mu_cur):
            # Fold kappa into the tiny (bt,k,c) operand (exact: kappa does not
            # appear in the reference's mu update), not into the big x slab.
            mu_b = (KAPPA * mu_cur).astype(jnp.bfloat16)
            # scores (bt,k,n) = einsum('bkc,bcn->bkn'): canonical MXU contraction.
            z = jax.lax.dot_general(
                mu_b, x, (((2,), (1,)), ((0,), (0,))),
                preferred_element_type=jnp.float32)
            # softmax over k (cheap sublane reduce; exp + approx recip on EUP).
            z = z - jnp.max(z, axis=1, keepdims=True)
            z = jnp.exp(z)
            z = z * pl.reciprocal(jnp.sum(z, axis=1, keepdims=True), approx=True)
            # normalize over the *valid* spatial positions; exact divide on the
            # tiny (bt,k,1) denominator since this value feeds the mu update.
            s_n = jnp.sum(z, axis=2, keepdims=True)
            if pad_cols:
                s_n = s_n - pad_corr
            z_n = z * (1.0 / (EPS + s_n))
            # mu_new (bt,k,c) = einsum('bkn,bnc->bkc') on the pre-transposed x:
            # canonical MXU contraction, no per-stage relayout of the big slab.
            mu_new = jax.lax.dot_general(
                z_n.astype(jnp.bfloat16), xt, (((2,), (1,)), ((0,), (0,))),
                preferred_element_type=jnp.float32)
            # l2 normalize over channels: mu / (eps + ||mu||) like the reference
            # (sqrt + divide are on a tiny (bt,k,1) tensor -> negligible cost).
            inv_norm = 1.0 / (EPS + jnp.sqrt(
                jnp.sum(mu_new * mu_new, axis=2, keepdims=True)))
            return mu_new * inv_norm, z_n

        # All but the last stage only need mu as carry; earlier z values are dead.
        mu = jax.lax.fori_loop(0, stage_num - 1,
                               lambda _, m: stage(m)[0], mu, unroll=True)
        mu_f, z_f = stage(mu)                     # peeled final stage

        mu_out_ref[...] = mu_f                    # (bt, k, c) — already "permuted"
        z_out_ref[...] = z_f                      # (bt, k, n_pad) lane-dense store

    return em_kernel


def _vmem_capacity_bytes() -> int:
    """Physical VMEM of the attached TPU; falls back to the v7x 64 MiB floor."""
    try:
        return int(pltpu.get_tpu_info().vmem_capacity_bytes)
    except Exception:
        return 64 * 1024 * 1024


def _pick_batch_tile(b: int, c: int, k: int, n_pad: int, vmem_limit: int) -> int:
    """Largest batch tile whose blocks + temporaries fit the VMEM budget,
    capped so the 1-D grid has >= 2 steps (keeps both v7x TensorCores busy)."""
    x_slab = c * n_pad * 2                       # one bf16 (c, n_pad) slab
    per_bt = (
        2 * 2 * x_slab                           # x and x_t blocks, double-buffered
        + 2 * k * n_pad * 4                      # z_out block, double-buffered
        + 6 * k * n_pad * 4                      # in-kernel z temporaries (generous)
        + 8 * k * c * 4                          # mu temporaries + mu_out buffers
    )
    budget = int(0.70 * vmem_limit)              # headroom for spills / misc
    bt = max(1, budget // max(per_bt, 1))
    if b >= 2:
        bt = min(bt, (b + 1) // 2)               # guarantee >= 2 grid steps
    return max(1, min(bt, b))


def pmm_em(x, mu0_kc, stage_num):
    """x: (b, c, n) f32, mu0_kc: (k, c) f32 -> (mu (b,k,c) f32, z_ (b,k,n) f32)."""
    assert stage_num >= 1, "PMMs EM needs at least one stage"
    b, c, n = x.shape
    k = mu0_kc.shape[0]
    n_pad = ((n + 127) // 128) * 128

    cap = _vmem_capacity_bytes()
    # ~100 MiB on v5e/v6e (128 MiB physical), ~51 MiB on v7x (64 MiB physical).
    vmem_limit = int(min(0.80 * cap, 100 * 1024 * 1024))
    bt = _pick_batch_tile(b, c, k, n_pad, vmem_limit)
    b_pad = ((b + bt - 1) // bt) * bt

    if b_pad != b or n_pad != n:
        x = jnp.pad(x, ((0, b_pad - b), (0, 0), (0, n_pad - n)))
    x_bf = x.astype(jnp.bfloat16)                 # halves HBM + VMEM, bf16 MXU path
    xt_bf = jnp.transpose(x_bf, (0, 2, 1))        # transpose ONCE in XLA, not per stage

    grid = (b_pad // bt,)
    kernel = _make_em_kernel(stage_num, bt, c, n_pad, n, k)
    mu_out, z_out = pl.pallas_call(
        kernel,
        out_shape=(
            jax.ShapeDtypeStruct((b_pad, k, c), jnp.float32),
            jax.ShapeDtypeStruct((b_pad, k, n_pad), jnp.float32),
        ),
        grid_spec=pltpu.PrefetchScalarGridSpec(
            num_scalar_prefetch=0,
            grid=grid,
            in_specs=[
                pl.BlockSpec((bt, c, n_pad), lambda i: (i, 0, 0)),   # x (bf16)
                pl.BlockSpec((bt, n_pad, c), lambda i: (i, 0, 0)),   # x^T (bf16)
                pl.BlockSpec((k, c), lambda i: (0, 0)),              # shared init mu
            ],
            out_specs=(
                pl.BlockSpec((bt, k, c), lambda i: (i, 0, 0)),
                pl.BlockSpec((bt, k, n_pad), lambda i: (i, 0, 0)),
            ),
        ),
        compiler_params=pltpu.CompilerParams(
            dimension_semantics=("parallel",),
            vmem_limit_bytes=vmem_limit,
        ),
    )(x_bf, xt_bf, mu0_kc)
    return mu_out[:b], z_out[:b, :, :n]


class PMMsPallas:
    """Pallas port of the PyTorch PMMs module's forward pass."""

    def __init__(self, c, k=3, stage_num=10, seed=42):
        self.stage_num = stage_num
        self.num_pro = k
        self.kappa = KAPPA
        # Deterministic synthetic init matching: normal(0, sqrt(2/k)) then l2norm over c.
        key = jax.random.PRNGKey(seed)
        mu = jax.random.normal(key, (1, c, k), jnp.float32) * math.sqrt(2.0 / k)
        self.mu = mu / (EPS + jnp.linalg.norm(mu, axis=1, keepdims=True))
        # Kernel-friendly (k, c) layout: k on sublanes, channels lane-dense.
        self.mu_kc = jnp.transpose(self.mu[0], (1, 0))

    def __call__(self, feature):
        b, c, h, w = feature.shape
        # generate_prototype: mask = ones -> z = feature.
        x = feature.reshape(b, c, h * w).astype(jnp.float32)
        mu_f, z_kn = pmm_em(x, self.mu_kc, self.stage_num)   # (b,k,c), (b,k,n)
        z_ = jnp.transpose(z_kn, (0, 2, 1))                  # (b, n, k) as in torch
        prototypes = [mu_f[:, i, :][:, :, None, None] for i in range(self.num_pro)]
        # TODO(synk): get_prototype(mask_bg * feature) runs EM on an all-zero tensor and its
        # result (mu_b) never reaches the forward output, so that dead compute is skipped.
        return prototypes, z_


def _em_reference(x, mu0, stage_num):
    """Pure-JAX f32 reference of PMMs.EM for verification."""
    b = x.shape[0]
    mu = jnp.broadcast_to(mu0, (b,) + mu0.shape[1:])
    z_ = None
    for _ in range(stage_num):
        z = KAPPA * jnp.einsum("bcn,bck->bnk", x, mu)
        z = jax.nn.softmax(z, axis=2)
        z_ = z / (EPS + jnp.sum(z, axis=1, keepdims=True))
        mu = jnp.einsum("bcn,bnk->bck", x, z_)
        mu = mu / (EPS + jnp.linalg.norm(mu, axis=1, keepdims=True))
    return jnp.transpose(mu, (0, 2, 1)), z_


if __name__ == "__main__":
    b, c, h, w = 2, 32, 8, 8
    k, stage_num = 4, 10

    key = jax.random.PRNGKey(0)
    feature = 0.1 * jax.random.normal(key, (b, c, h, w), jnp.float32)

    model = PMMsPallas(c, k=k, stage_num=stage_num)
    prototypes, z_ = model(feature)

    z_ = jax.block_until_ready(z_)
    prototypes = [jax.block_until_ready(p) for p in prototypes]

    # Shape / sanity checks (mirror PyTorch output structure).
    assert len(prototypes) == k
    assert all(p.shape == (b, c, 1, 1) for p in prototypes)
    assert z_.shape == (b, h * w, k)
    assert bool(jnp.all(jnp.isfinite(z_)))

    # Verify against a pure-JAX f32 reference of the same math.  The kernel
    # feeds the MXU bf16 operands (f32 accumulation), so tolerance is slightly
    # looser than a pure-f32 comparison.
    mu_ref, z_ref = _em_reference(feature.reshape(b, c, h * w), model.mu, stage_num)
    mu_kernel = jnp.stack([p[:, :, 0, 0] for p in prototypes], axis=1)  # (b, k, c)
    assert np.allclose(np.asarray(mu_kernel), np.asarray(mu_ref), atol=3e-2, rtol=3e-2)
    assert np.allclose(np.asarray(z_), np.asarray(z_ref), atol=3e-2, rtol=3e-2)

    print("KERNEL_OK")
</pallas_src>

<mosaic_0001>
module attributes {stable_mosaic.version = 11 : i64} {
  func.func @em_kernel(%arg0: i32, %arg1: memref<1x32x128xbf16, #tpu.memory_space<vmem>>, %arg2: memref<1x128x32xbf16, #tpu.memory_space<vmem>>, %arg3: memref<4x32xf32, #tpu.memory_space<vmem>>, %arg4: memref<1x4x32xf32, #tpu.memory_space<vmem>>, %arg5: memref<1x4x128xf32, #tpu.memory_space<vmem>>) attributes {dimension_semantics = [#tpu.dimension_semantics<parallel>], iteration_bounds = array<i64: 2>, scalar_prefetch = 0 : i64, scratch_operands = 0 : i64, tpu.core_type = #tpu.core_type<tc>, window_params = [{transform_indices = @transform_0, window_bounds = array<i64: 1, 32, 128>}, {transform_indices = @transform_1, window_bounds = array<i64: 1, 128, 32>}, {pipeline_mode = #tpu.pipeline_mode<synchronous>, transform_indices = @transform_2, window_bounds = array<i64: 4, 32>}, {transform_indices = @transform_3, window_bounds = array<i64: 1, 4, 32>}, {transform_indices = @transform_4, window_bounds = array<i64: 1, 4, 128>}]} {
    %c0 = arith.constant 0 : index
    %c0_0 = arith.constant 0 : index
    %c0_1 = arith.constant 0 : index
    %0 = vector.load %arg1[%c0, %c0_0, %c0_1] : memref<1x32x128xbf16, #tpu.memory_space<vmem>>, vector<1x32x128xbf16>
    %c0_2 = arith.constant 0 : index
    %c0_3 = arith.constant 0 : index
    %c0_4 = arith.constant 0 : index
    %1 = vector.load %arg2[%c0_2, %c0_3, %c0_4] : memref<1x128x32xbf16, #tpu.memory_space<vmem>>, vector<1x128x32xbf16>
    %c0_5 = arith.constant 0 : index
    %c0_6 = arith.constant 0 : index
    %2 = vector.load %arg3[%c0_5, %c0_6] : memref<4x32xf32, #tpu.memory_space<vmem>>, vector<4x32xf32>
    %3 = vector.shape_cast %2 : vector<4x32xf32> to vector<1x4x32xf32>
    %c0_i32 = arith.constant 0 : i32
    %cst = arith.constant 2.000000e+01 : f32
    %4 = vector.broadcast %cst : f32 to vector<1x4x32xf32>
    %5 = arith.mulf %4, %3 : vector<1x4x32xf32>
    %6 = arith.truncf %5 : vector<1x4x32xf32> to vector<1x4x32xbf16>
    %cst_7 = arith.constant dense<0.000000e+00> : vector<1x4x128xf32>
    %7 = tpu.matmul %6, %0, %cst_7 {dimension_numbers = #tpu.dot_dimension_numbers<[2], [1], [1], [2], [0, 0, 0, 1, 1, 2], [0], [0]>} : vector<1x4x32xbf16>, vector<1x32x128xbf16>, vector<1x4x128xf32> -> vector<1x4x128xf32>
    %cst_8 = arith.constant dense<0xFF800000> : vector<1x128xf32>
    %8 = vector.multi_reduction <maximumf>, %7, %cst_8 [1] : vector<1x4x128xf32> to vector<1x128xf32>
    %9 = vector.shape_cast %8 : vector<1x128xf32> to vector<1x1x128xf32>
    %10 = vector.broadcast %9 : vector<1x1x128xf32> to vector<1x4x128xf32>
    %11 = arith.subf %7, %10 : vector<1x4x128xf32>
    %12 = math.exp %11 : vector<1x4x128xf32>
    %cst_9 = arith.constant dense<0.000000e+00> : vector<1x128xf32>
    %13 = vector.multi_reduction <add>, %12, %cst_9 [1] : vector<1x4x128xf32> to vector<1x128xf32>
    %14 = vector.shape_cast %13 : vector<1x128xf32> to vector<1x1x128xf32>
    %15 = tpu.reciprocal %14 {approx = true} : vector<1x1x128xf32> -> vector<1x1x128xf32>
    %16 = vector.broadcast %15 : vector<1x1x128xf32> to vector<1x4x128xf32>
    %17 = arith.mulf %12, %16 : vector<1x4x128xf32>
    %cst_10 = arith.constant dense<0.000000e+00> : vector<1x4xf32>
    %18 = vector.multi_reduction <add>, %17, %cst_10 [2] : vector<1x4x128xf32> to vector<1x4xf32>
    %19 = vector.shape_cast %18 : vector<1x4xf32> to vector<1x4x1xf32>
    %cst_11 = arith.constant 1.600000e+01 : f32
    %20 = vector.broadcast %cst_11 : f32 to vector<1x4x1xf32>
    %21 = arith.subf %19, %20 : vector<1x4x1xf32>
    %cst_12 = arith.constant 9.99999997E-7 : f32
    %22 = vector.broadcast %cst_12 : f32 to vector<1x4x1xf32>
    %23 = arith.addf %22, %21 : vector<1x4x1xf32>
    %cst_13 = arith.constant 1.000000e+00 : f32
    %24 = vector.broadcast %cst_13 : f32 to vector<1x4x1xf32>
    %25 = arith.divf %24, %23 : vector<1x4x1xf32>
    %26 = vector.broadcast %25 : vector<1x4x1xf32> to vector<1x4x128xf32>
    %27 = arith.mulf %17, %26 : vector<1x4x128xf32>
    %28 = arith.truncf %27 : vector<1x4x128xf32> to vector<1x4x128xbf16>
    %cst_14 = arith.constant dense<0.000000e+00> : vector<1x4x32xf32>
    %29 = tpu.matmul %28, %1, %cst_14 {dimension_numbers = #tpu.dot_dimension_numbers<[2], [1], [1], [2], [0, 0, 0, 1, 1, 2], [0], [0]>} : vector<1x4x128xbf16>, vector<1x128x32xbf16>, vector<1x4x32xf32> -> vector<1x4x32xf32>
    %30 = arith.mulf %29, %29 : vector<1x4x32xf32>
    %cst_15 = arith.constant dense<0.000000e+00> : vector<1x4xf32>
    %31 = vector.multi_reduction <add>, %30, %cst_15 [2] : vector<1x4x32xf32> to vector<1x4xf32>
    %32 = vector.shape_cast %31 : vector<1x4xf32> to vector<1x4x1xf32>
    %33 = math.sqrt %32 : vector<1x4x1xf32>
    %cst_16 = arith.constant 9.99999997E-7 : f32
    %34 = vector.broadcast %cst_16 : f32 to vector<1x4x1xf32>
    %35 = arith.addf %34, %33 : vector<1x4x1xf32>
    %cst_17 = arith.constant 1.000000e+00 : f32
    %36 = vector.broadcast %cst_17 : f32 to vector<1x4x1xf32>
    %37 = arith.divf %36, %35 : vector<1x4x1xf32>
    %38 = vector.broadcast %37 : vector<1x4x1xf32> to vector<1x4x32xf32>
    %39 = arith.mulf %29, %38 : vector<1x4x32xf32>
    %c1_i32 = arith.constant 1 : i32
    %cst_18 = arith.constant 2.000000e+01 : f32
    %40 = vector.broadcast %cst_18 : f32 to vector<1x4x32xf32>
    %41 = arith.mulf %40, %39 : vector<1x4x32xf32>
    %42 = arith.truncf %41 : vector<1x4x32xf32> to vector<1x4x32xbf16>
    %cst_19 = arith.constant dense<0.000000e+00> : vector<1x4x128xf32>
    %43 = tpu.matmul %42, %0, %cst_19 {dimension_numbers = #tpu.dot_dimension_numbers<[2], [1], [1], [2], [0, 0, 0, 1, 1, 2], [0], [0]>} : vector<1x4x32xbf16>, vector<1x32x128xbf16>, vector<1x4x128xf32> -> vector<1x4x128xf32>
    %cst_20 = arith.constant dense<0xFF800000> : vector<1x128xf32>
    %44 = vector.multi_reduction <maximumf>, %43, %cst_20 [1] : vector<1x4x128xf32> to vector<1x128xf32>
    %45 = vector.shape_cast %44 : vector<1x128xf32> to vector<1x1x128xf32>
    %46 = vector.broadcast %45 : vector<1x1x128xf32> to vector<1x4x128xf32>
    %47 = arith.subf %43, %46 : vector<1x4x128xf32>
    %48 = math.exp %47 : vector<1x4x128xf32>
    %cst_21 = arith.constant dense<0.000000e+00> : vector<1x128xf32>
    %49 = vector.multi_reduction <add>, %48, %cst_21 [1] : vector<1x4x128xf32> to vector<1x128xf32>
    %50 = vector.shape_cast %49 : vector<1x128xf32> to vector<1x1x128xf32>
    %51 = tpu.reciprocal %50 {approx = true} : vector<1x1x128xf32> -> vector<1x1x128xf32>
    %52 = vector.broadcast %51 : vector<1x1x128xf32> to vector<1x4x128xf32>
    %53 = arith.mulf %48, %52 : vector<1x4x128xf32>
    %cst_22 = arith.constant dense<0.000000e+00> : vector<1x4xf32>
    %54 = vector.multi_reduction <add>, %53, %cst_22 [2] : vector<1x4x128xf32> to vector<1x4xf32>
    %55 = vector.shape_cast %54 : vector<1x4xf32> to vector<1x4x1xf32>
    %cst_23 = arith.constant 1.600000e+01 : f32
    %56 = vector.broadcast %cst_23 : f32 to vector<1x4x1xf32>
    %57 = arith.subf %55, %56 : vector<1x4x1xf32>
    %cst_24 = arith.constant 9.99999997E-7 : f32
    %58 = vector.broadcast %cst_24 : f32 to vector<1x4x1xf32>
    %59 = arith.addf %58, %57 : vector<1x4x1xf32>
    %cst_25 = arith.constant 1.000000e+00 : f32
    %60 = vector.broadcast %cst_25 : f32 to vector<1x4x1xf32>
    %61 = arith.divf %60, %59 : vector<1x4x1xf32>
    %62 = vector.broadcast %61 : vector<1x4x1xf32> to vector<1x4x128xf32>
    %63 = arith.mulf %53, %62 : vector<1x4x128xf32>
    %64 = arith.truncf %63 : vector<1x4x128xf32> to vector<1x4x128xbf16>
    %cst_26 = arith.constant dense<0.000000e+00> : vector<1x4x32xf32>
    %65 = tpu.matmul %64, %1, %cst_26 {dimension_numbers = #tpu.dot_dimension_numbers<[2], [1], [1], [2], [0, 0, 0, 1, 1, 2], [0], [0]>} : vector<1x4x128xbf16>, vector<1x128x32xbf16>, vector<1x4x32xf32> -> vector<1x4x32xf32>
    %66 = arith.mulf %65, %65 : vector<1x4x32xf32>
    %cst_27 = arith.constant dense<0.000000e+00> : vector<1x4xf32>
    %67 = vector.multi_reduction <add>, %66, %cst_27 [2] : vector<1x4x32xf32> to vector<1x4xf32>
    %68 = vector.shape_cast %67 : vector<1x4xf32> to vector<1x4x1xf32>
    %69 = math.sqrt %68 : vector<1x4x1xf32>
    %cst_28 = arith.constant 9.99999997E-7 : f32
    %70 = vector.broadcast %cst_28 : f32 to vector<1x4x1xf32>
    %71 = arith.addf %70, %69 : vector<1x4x1xf32>
    %cst_29 = arith.constant 1.000000e+00 : f32
    %72 = vector.broadcast %cst_29 : f32 to vector<1x4x1xf32>
    %73 = arith.divf %72, %71 : vector<1x4x1xf32>
    %74 = vector.broadcast %73 : vector<1x4x1xf32> to vector<1x4x32xf32>
    %75 = arith.mulf %65, %74 : vector<1x4x32xf32>
    %c2_i32 = arith.constant 2 : i32
    %cst_30 = arith.constant 2.000000e+01 : f32
    %76 = vector.broadcast %cst_30 : f32 to vector<1x4x32xf32>
    %77 = arith.mulf %76, %75 : vector<1x4x32xf32>
    %78 = arith.truncf %77 : vector<1x4x32xf32> to vector<1x4x32xbf16>
    %cst_31 = arith.constant dense<0.000000e+00> : vector<1x4x128xf32>
    %79 = tpu.matmul %78, %0, %cst_31 {dimension_numbers = #tpu.dot_dimension_numbers<[2], [1], [1], [2], [0, 0, 0, 1, 1, 2], [0], [0]>} : vector<1x4x32xbf16>, vector<1x32x128xbf16>, vector<1x4x128xf32> -> vector<1x4x128xf32>
    %cst_32 = arith.constant dense<0xFF800000> : vector<1x128xf32>
    %80 = vector.multi_reduction <maximumf>, %79, %cst_32 [1] : vector<1x4x128xf32> to vector<1x128xf32>
    %81 = vector.shape_cast %80 : vector<1x128xf32> to vector<1x1x128xf32>
    %82 = vector.broadcast %81 : vector<1x1x128xf32> to vector<1x4x128xf32>
    %83 = arith.subf %79, %82 : vector<1x4x128xf32>
    %84 = math.exp %83 : vector<1x4x128xf32>
    %cst_33 = arith.constant dense<0.000000e+00> : vector<1x128xf32>
    %85 = vector.multi_reduction <add>, %84, %cst_33 [1] : vector<1x4x128xf32> to vector<1x128xf32>
    %86 = vector.shape_cast %85 : vector<1x128xf32> to vector<1x1x128xf32>
    %87 = tpu.reciprocal %86 {approx = true} : vector<1x1x128xf32> -> vector<1x1x128xf32>
    %88 = vector.broadcast %87 : vector<1x1x128xf32> to vector<1x4x128xf32>
    %89 = arith.mulf %84, %88 : vector<1x4x128xf32>
    %cst_34 = arith.constant dense<0.000000e+00> : vector<1x4xf32>
    %90 = vector.multi_reduction <add>, %89, %cst_34 [2] : vector<1x4x128xf32> to vector<1x4xf32>
    %91 = vector.shape_cast %90 : vector<1x4xf32> to vector<1x4x1xf32>
    %cst_35 = arith.constant 1.600000e+01 : f32
    %92 = vector.broadcast %cst_35 : f32 to vector<1x4x1xf32>
    %93 = arith.subf %91, %92 : vector<1x4x1xf32>
    %cst_36 = arith.constant 9.99999997E-7 : f32
    %94 = vector.broadcast %cst_36 : f32 to vector<1x4x1xf32>
    %95 = arith.addf %94, %93 : vector<1x4x1xf32>
    %cst_37 = arith.constant 1.000000e+00 : f32
    %96 = vector.broadcast %cst_37 : f32 to vector<1x4x1xf32>
    %97 = arith.divf %96, %95 : vector<1x4x1xf32>
    %98 = vector.broadcast %97 : vector<1x4x1xf32> to vector<1x4x128xf32>
    %99 = arith.mulf %89, %98 : vector<1x4x128xf32>
    %100 = arith.truncf %99 : vector<1x4x128xf32> to vector<1x4x128xbf16>
    %cst_38 = arith.constant dense<0.000000e+00> : vector<1x4x32xf32>
    %101 = tpu.matmul %100, %1, %cst_38 {dimension_numbers = #tpu.dot_dimension_numbers<[2], [1], [1], [2], [0, 0, 0, 1, 1, 2], [0], [0]>} : vector<1x4x128xbf16>, vector<1x128x32xbf16>, vector<1x4x32xf32> -> vector<1x4x32xf32>
    %102 = arith.mulf %101, %101 : vector<1x4x32xf32>
    %cst_39 = arith.constant dense<0.000000e+00> : vector<1x4xf32>
    %103 = vector.multi_reduction <add>, %102, %cst_39 [2] : vector<1x4x32xf32> to vector<1x4xf32>
    %104 = vector.shape_cast %103 : vector<1x4xf32> to vector<1x4x1xf32>
    %105 = math.sqrt %104 : vector<1x4x1xf32>
    %cst_40 = arith.constant 9.99999997E-7 : f32
    %106 = vector.broadcast %cst_40 : f32 to vector<1x4x1xf32>
    %107 = arith.addf %106, %105 : vector<1x4x1xf32>
    %cst_41 = arith.constant 1.000000e+00 : f32
    %108 = vector.broadcast %cst_41 : f32 to vector<1x4x1xf32>
    %109 = arith.divf %108, %107 : vector<1x4x1xf32>
    %110 = vector.broadcast %109 : vector<1x4x1xf32> to vector<1x4x32xf32>
    %111 = arith.mulf %101, %110 : vector<1x4x32xf32>
    %c3_i32 = arith.constant 3 : i32
    %cst_42 = arith.constant 2.000000e+01 : f32
    %112 = vector.broadcast %cst_42 : f32 to vector<1x4x32xf32>
    %113 = arith.mulf %112, %111 : vector<1x4x32xf32>
    %114 = arith.truncf %113 : vector<1x4x32xf32> to vector<1x4x32xbf16>
    %cst_43 = arith.constant dense<0.000000e+00> : vector<1x4x128xf32>
    %115 = tpu.matmul %114, %0, %cst_43 {dimension_numbers = #tpu.dot_dimension_numbers<[2], [1], [1], [2], [0, 0, 0, 1, 1, 2], [0], [0]>} : vector<1x4x32xbf16>, vector<1x32x128xbf16>, vector<1x4x128xf32> -> vector<1x4x128xf32>
    %cst_44 = arith.constant dense<0xFF800000> : vector<1x128xf32>
    %116 = vector.multi_reduction <maximumf>, %115, %cst_44 [1] : vector<1x4x128xf32> to vector<1x128xf32>
    %117 = vector.shape_cast %116 : vector<1x128xf32> to vector<1x1x128xf32>
    %118 = vector.broadcast %117 : vector<1x1x128xf32> to vector<1x4x128xf32>
    %119 = arith.subf %115, %118 : vector<1x4x128xf32>
    %120 = math.exp %119 : vector<1x4x128xf32>
    %cst_45 = arith.constant dense<0.000000e+00> : vector<1x128xf32>
    %121 = vector.multi_reduction <add>, %120, %cst_45 [1] : vector<1x4x128xf32> to vector<1x128xf32>
    %122 = vector.shape_cast %121 : vector<1x128xf32> to vector<1x1x128xf32>
    %123 = tpu.reciprocal %122 {approx = true} : vector<1x1x128xf32> -> vector<1x1x128xf32>
    %124 = vector.broadcast %123 : vector<1x1x128xf32> to vector<1x4x128xf32>
    %125 = arith.mulf %120, %124 : vector<1x4x128xf32>
    %cst_46 = arith.constant dense<0.000000e+00> : vector<1x4xf32>
    %126 = vector.multi_reduction <add>, %125, %cst_46 [2] : vector<1x4x128xf32> to vector<1x4xf32>
    %127 = vector.shape_cast %126 : vector<1x4xf32> to vector<1x4x1xf32>
    %cst_47 = arith.constant 1.600000e+01 : f32
    %128 = vector.broadcast %cst_47 : f32 to vector<1x4x1xf32>
    %129 = arith.subf %127, %128 : vector<1x4x1xf32>
    %cst_48 = arith.constant 9.99999997E-7 : f32
    %130 = vector.broadcast %cst_48 : f32 to vector<1x4x1xf32>
    %131 = arith.addf %130, %129 : vector<1x4x1xf32>
    %cst_49 = arith.constant 1.000000e+00 : f32
    %132 = vector.broadcast %cst_49 : f32 to vector<1x4x1xf32>
    %133 = arith.divf %132, %131 : vector<1x4x1xf32>
    %134 = vector.broadcast %133 : vector<1x4x1xf32> to vector<1x4x128xf32>
    %135 = arith.mulf %125, %134 : vector<1x4x128xf32>
    %136 = arith.truncf %135 : vector<1x4x128xf32> to vector<1x4x128xbf16>
    %cst_50 = arith.constant dense<0.000000e+00> : vector<1x4x32xf32>
    %137 = tpu.matmul %136, %1, %cst_50 {dimension_numbers = #tpu.dot_dimension_numbers<[2], [1], [1], [2], [0, 0, 0, 1, 1, 2], [0], [0]>} : vector<1x4x128xbf16>, vector<1x128x32xbf16>, vector<1x4x32xf32> -> vector<1x4x32xf32>
    %138 = arith.mulf %137, %137 : vector<1x4x32xf32>
    %cst_51 = arith.constant dense<0.000000e+00> : vector<1x4xf32>
    %139 = vector.multi_reduction <add>, %138, %cst_51 [2] : vector<1x4x32xf32> to vector<1x4xf32>
    %140 = vector.shape_cast %139 : vector<1x4xf32> to vector<1x4x1xf32>
    %141 = math.sqrt %140 : vector<1x4x1xf32>
    %cst_52 = arith.constant 9.99999997E-7 : f32
    %142 = vector.broadcast %cst_52 : f32 to vector<1x4x1xf32>
    %143 = arith.addf %142, %141 : vector<1x4x1xf32>
    %cst_53 = arith.constant 1.000000e+00 : f32
    %144 = vector.broadcast %cst_53 : f32 to vector<1x4x1xf32>
    %145 = arith.divf %144, %143 : vector<1x4x1xf32>
    %146 = vector.broadcast %145 : vector<1x4x1xf32> to vector<1x4x32xf32>
    %147 = arith.mulf %137, %146 : vector<1x4x32xf32>
    %c4_i32 = arith.constant 4 : i32
    %cst_54 = arith.constant 2.000000e+01 : f32
    %148 = vector.broadcast %cst_54 : f32 to vector<1x4x32xf32>
    %149 = arith.mulf %148, %147 : vector<1x4x32xf32>
    %150 = arith.truncf %149 : vector<1x4x32xf32> to vector<1x4x32xbf16>
    %cst_55 = arith.constant dense<0.000000e+00> : vector<1x4x128xf32>
    %151 = tpu.matmul %150, %0, %cst_55 {dimension_numbers = #tpu.dot_dimension_numbers<[2], [1], [1], [2], [0, 0, 0, 1, 1, 2], [0], [0]>} : vector<1x4x32xbf16>, vector<1x32x128xbf16>, vector<1x4x128xf32> -> vector<1x4x128xf32>
    %cst_56 = arith.constant dense<0xFF800000> : vector<1x128xf32>
    %152 = vector.multi_reduction <maximumf>, %151, %cst_56 [1] : vector<1x4x128xf32> to vector<1x128xf32>
    %153 = vector.shape_cast %152 : vector<1x128xf32> to vector<1x1x128xf32>
    %154 = vector.broadcast %153 : vector<1x1x128xf32> to vector<1x4x128xf32>
    %155 = arith.subf %151, %154 : vector<1x4x128xf32>
    %156 = math.exp %155 : vector<1x4x128xf32>
    %cst_57 = arith.constant dense<0.000000e+00> : vector<1x128xf32>
    %157 = vector.multi_reduction <add>, %156, %cst_57 [1] : vector<1x4x128xf32> to vector<1x128xf32>
    %158 = vector.shape_cast %157 : vector<1x128xf32> to vector<1x1x128xf32>
    %159 = tpu.reciprocal %158 {approx = true} : vector<1x1x128xf32> -> vector<1x1x128xf32>
    %160 = vector.broadcast %159 : vector<1x1x128xf32> to vector<1x4x128xf32>
    %161 = arith.mulf %156, %160 : vector<1x4x128xf32>
    %cst_58 = arith.constant dense<0.000000e+00> : vector<1x4xf32>
    %162 = vector.multi_reduction <add>, %161, %cst_58 [2] : vector<1x4x128xf32> to vector<1x4xf32>
    %163 = vector.shape_cast %162 : vector<1x4xf32> to vector<1x4x1xf32>
    %cst_59 = arith.constant 1.600000e+01 : f32
    %164 = vector.broadcast %cst_59 : f32 to vector<1x4x1xf32>
    %165 = arith.subf %163, %164 : vector<1x4x1xf32>
    %cst_60 = arith.constant 9.99999997E-7 : f32
    %166 = vector.broadcast %cst_60 : f32 to vector<1x4x1xf32>
    %167 = arith.addf %166, %165 : vector<1x4x1xf32>
    %cst_61 = arith.constant 1.000000e+00 : f32
    %168 = vector.broadcast %cst_61 : f32 to vector<1x4x1xf32>
    %169 = arith.divf %168, %167 : vector<1x4x1xf32>
    %170 = vector.broadcast %169 : vector<1x4x1xf32> to vector<1x4x128xf32>
    %171 = arith.mulf %161, %170 : vector<1x4x128xf32>
    %172 = arith.truncf %171 : vector<1x4x128xf32> to vector<1x4x128xbf16>
    %cst_62 = arith.constant dense<0.000000e+00> : vector<1x4x32xf32>
    %173 = tpu.matmul %172, %1, %cst_62 {dimension_numbers = #tpu.dot_dimension_numbers<[2], [1], [1], [2], [0, 0, 0, 1, 1, 2], [0], [0]>} : vector<1x4x128xbf16>, vector<1x128x32xbf16>, vector<1x4x32xf32> -> vector<1x4x32xf32>
    %174 = arith.mulf %173, %173 : vector<1x4x32xf32>
    %cst_63 = arith.constant dense<0.000000e+00> : vector<1x4xf32>
    %175 = vector.multi_reduction <add>, %174, %cst_63 [2] : vector<1x4x32xf32> to vector<1x4xf32>
    %176 = vector.shape_cast %175 : vector<1x4xf32> to vector<1x4x1xf32>
    %177 = math.sqrt %176 : vector<1x4x1xf32>
    %cst_64 = arith.constant 9.99999997E-7 : f32
    %178 = vector.broadcast %cst_64 : f32 to vector<1x4x1xf32>
    %179 = arith.addf %178, %177 : vector<1x4x1xf32>
    %cst_65 = arith.constant 1.000000e+00 : f32
    %180 = vector.broadcast %cst_65 : f32 to vector<1x4x1xf32>
    %181 = arith.divf %180, %179 : vector<1x4x1xf32>
    %182 = vector.broadcast %181 : vector<1x4x1xf32> to vector<1x4x32xf32>
    %183 = arith.mulf %173, %182 : vector<1x4x32xf32>
    %c5_i32 = arith.constant 5 : i32
    %cst_66 = arith.constant 2.000000e+01 : f32
    %184 = vector.broadcast %cst_66 : f32 to vector<1x4x32xf32>
    %185 = arith.mulf %184, %183 : vector<1x4x32xf32>
    %186 = arith.truncf %185 : vector<1x4x32xf32> to vector<1x4x32xbf16>
    %cst_67 = arith.constant dense<0.000000e+00> : vector<1x4x128xf32>
    %187 = tpu.matmul %186, %0, %cst_67 {dimension_numbers = #tpu.dot_dimension_numbers<[2], [1], [1], [2], [0, 0, 0, 1, 1, 2], [0], [0]>} : vector<1x4x32xbf16>, vector<1x32x128xbf16>, vector<1x4x128xf32> -> vector<1x4x128xf32>
    %cst_68 = arith.constant dense<0xFF800000> : vector<1x128xf32>
    %188 = vector.multi_reduction <maximumf>, %187, %cst_68 [1] : vector<1x4x128xf32> to vector<1x128xf32>
    %189 = vector.shape_cast %188 : vector<1x128xf32> to vector<1x1x128xf32>
    %190 = vector.broadcast %189 : vector<1x1x128xf32> to vector<1x4x128xf32>
    %191 = arith.subf %187, %190 : vector<1x4x128xf32>
    %192 = math.exp %191 : vector<1x4x128xf32>
    %cst_69 = arith.constant dense<0.000000e+00> : vector<1x128xf32>
    %193 = vector.multi_reduction <add>, %192, %cst_69 [1] : vector<1x4x128xf32> to vector<1x128xf32>
    %194 = vector.shape_cast %193 : vector<1x128xf32> to vector<1x1x128xf32>
    %195 = tpu.reciprocal %194 {approx = true} : vector<1x1x128xf32> -> vector<1x1x128xf32>
    %196 = vector.broadcast %195 : vector<1x1x128xf32> to vector<1x4x128xf32>
    %197 = arith.mulf %192, %196 : vector<1x4x128xf32>
    %cst_70 = arith.constant dense<0.000000e+00> : vector<1x4xf32>
    %198 = vector.multi_reduction <add>, %197, %cst_70 [2] : vector<1x4x128xf32> to vector<1x4xf32>
    %199 = vector.shape_cast %198 : vector<1x4xf32> to vector<1x4x1xf32>
    %cst_71 = arith.constant 1.600000e+01 : f32
    %200 = vector.broadcast %cst_71 : f32 to vector<1x4x1xf32>
    %201 = arith.subf %199, %200 : vector<1x4x1xf32>
    %cst_72 = arith.constant 9.99999997E-7 : f32
    %202 = vector.broadcast %cst_72 : f32 to vector<1x4x1xf32>
    %203 = arith.addf %202, %201 : vector<1x4x1xf32>
    %cst_73 = arith.constant 1.000000e+00 : f32
    %204 = vector.broadcast %cst_73 : f32 to vector<1x4x1xf32>
    %205 = arith.divf %204, %203 : vector<1x4x1xf32>
    %206 = vector.broadcast %205 : vector<1x4x1xf32> to vector<1x4x128xf32>
    %207 = arith.mulf %197, %206 : vector<1x4x128xf32>
    %208 = arith.truncf %207 : vector<1x4x128xf32> to vector<1x4x128xbf16>
    %cst_74 = arith.constant dense<0.000000e+00> : vector<1x4x32xf32>
    %209 = tpu.matmul %208, %1, %cst_74 {dimension_numbers = #tpu.dot_dimension_numbers<[2], [1], [1], [2], [0, 0, 0, 1, 1, 2], [0], [0]>} : vector<1x4x128xbf16>, vector<1x128x32xbf16>, vector<1x4x32xf32> -> vector<1x4x32xf32>
    %210 = arith.mulf %209, %209 : vector<1x4x32xf32>
    %cst_75 = arith.constant dense<0.000000e+00> : vector<1x4xf32>
    %211 = vector.multi_reduction <add>, %210, %cst_75 [2] : vector<1x4x32xf32> to vector<1x4xf32>
    %212 = vector.shape_cast %211 : vector<1x4xf32> to vector<1x4x1xf32>
    %213 = math.sqrt %212 : vector<1x4x1xf32>
    %cst_76 = arith.constant 9.99999997E-7 : f32
    %214 = vector.broadcast %cst_76 : f32 to vector<1x4x1xf32>
    %215 = arith.addf %214, %213 : vector<1x4x1xf32>
    %cst_77 = arith.constant 1.000000e+00 : f32
    %216 = vector.broadcast %cst_77 : f32 to vector<1x4x1xf32>
    %217 = arith.divf %216, %215 : vector<1x4x1xf32>
    %218 = vector.broadcast %217 : vector<1x4x1xf32> to vector<1x4x32xf32>
    %219 = arith.mulf %209, %218 : vector<1x4x32xf32>
    %c6_i32 = arith.constant 6 : i32
    %cst_78 = arith.constant 2.000000e+01 : f32
    %220 = vector.broadcast %cst_78 : f32 to vector<1x4x32xf32>
    %221 = arith.mulf %220, %219 : vector<1x4x32xf32>
    %222 = arith.truncf %221 : vector<1x4x32xf32> to vector<1x4x32xbf16>
    %cst_79 = arith.constant dense<0.000000e+00> : vector<1x4x128xf32>
    %223 = tpu.matmul %222, %0, %cst_79 {dimension_numbers = #tpu.dot_dimension_numbers<[2], [1], [1], [2], [0, 0, 0, 1, 1, 2], [0], [0]>} : vector<1x4x32xbf16>, vector<1x32x128xbf16>, vector<1x4x128xf32> -> vector<1x4x128xf32>
    %cst_80 = arith.constant dense<0xFF800000> : vector<1x128xf32>
    %224 = vector.multi_reduction <maximumf>, %223, %cst_80 [1] : vector<1x4x128xf32> to vector<1x128xf32>
    %225 = vector.shape_cast %224 : vector<1x128xf32> to vector<1x1x128xf32>
    %226 = vector.broadcast %225 : vector<1x1x128xf32> to vector<1x4x128xf32>
    %227 = arith.subf %223, %226 : vector<1x4x128xf32>
    %228 = math.exp %227 : vector<1x4x128xf32>
    %cst_81 = arith.constant dense<0.000000e+00> : vector<1x128xf32>
    %229 = vector.multi_reduction <add>, %228, %cst_81 [1] : vector<1x4x128xf32> to vector<1x128xf32>
    %230 = vector.shape_cast %229 : vector<1x128xf32> to vector<1x1x128xf32>
    %231 = tpu.reciprocal %230 {approx = true} : vector<1x1x128xf32> -> vector<1x1x128xf32>
    %232 = vector.broadcast %231 : vector<1x1x128xf32> to vector<1x4x128xf32>
    %233 = arith.mulf %228, %232 : vector<1x4x128xf32>
    %cst_82 = arith.constant dense<0.000000e+00> : vector<1x4xf32>
    %234 = vector.multi_reduction <add>, %233, %cst_82 [2] : vector<1x4x128xf32> to vector<1x4xf32>
    %235 = vector.shape_cast %234 : vector<1x4xf32> to vector<1x4x1xf32>
    %cst_83 = arith.constant 1.600000e+01 : f32
    %236 = vector.broadcast %cst_83 : f32 to vector<1x4x1xf32>
    %237 = arith.subf %235, %236 : vector<1x4x1xf32>
    %cst_84 = arith.constant 9.99999997E-7 : f32
    %238 = vector.broadcast %cst_84 : f32 to vector<1x4x1xf32>
    %239 = arith.addf %238, %237 : vector<1x4x1xf32>
    %cst_85 = arith.constant 1.000000e+00 : f32
    %240 = vector.broadcast %cst_85 : f32 to vector<1x4x1xf32>
    %241 = arith.divf %240, %239 : vector<1x4x1xf32>
    %242 = vector.broadcast %241 : vector<1x4x1xf32> to vector<1x4x128xf32>
    %243 = arith.mulf %233, %242 : vector<1x4x128xf32>
    %244 = arith.truncf %243 : vector<1x4x128xf32> to vector<1x4x128xbf16>
    %cst_86 = arith.constant dense<0.000000e+00> : vector<1x4x32xf32>
    %245 = tpu.matmul %244, %1, %cst_86 {dimension_numbers = #tpu.dot_dimension_numbers<[2], [1], [1], [2], [0, 0, 0, 1, 1, 2], [0], [0]>} : vector<1x4x128xbf16>, vector<1x128x32xbf16>, vector<1x4x32xf32> -> vector<1x4x32xf32>
    %246 = arith.mulf %245, %245 : vector<1x4x32xf32>
    %cst_87 = arith.constant dense<0.000000e+00> : vector<1x4xf32>
    %247 = vector.multi_reduction <add>, %246, %cst_87 [2] : vector<1x4x32xf32> to vector<1x4xf32>
    %248 = vector.shape_cast %247 : vector<1x4xf32> to vector<1x4x1xf32>
    %249 = math.sqrt %248 : vector<1x4x1xf32>
    %cst_88 = arith.constant 9.99999997E-7 : f32
    %250 = vector.broadcast %cst_88 : f32 to vector<1x4x1xf32>
    %251 = arith.addf %250, %249 : vector<1x4x1xf32>
    %cst_89 = arith.constant 1.000000e+00 : f32
    %252 = vector.broadcast %cst_89 : f32 to vector<1x4x1xf32>
    %253 = arith.divf %252, %251 : vector<1x4x1xf32>
    %254 = vector.broadcast %253 : vector<1x4x1xf32> to vector<1x4x32xf32>
    %255 = arith.mulf %245, %254 : vector<1x4x32xf32>
    %c7_i32 = arith.constant 7 : i32
    %cst_90 = arith.constant 2.000000e+01 : f32
    %256 = vector.broadcast %cst_90 : f32 to vector<1x4x32xf32>
    %257 = arith.mulf %256, %255 : vector<1x4x32xf32>
    %258 = arith.truncf %257 : vector<1x4x32xf32> to vector<1x4x32xbf16>
    %cst_91 = arith.constant dense<0.000000e+00> : vector<1x4x128xf32>
    %259 = tpu.matmul %258, %0, %cst_91 {dimension_numbers = #tpu.dot_dimension_numbers<[2], [1], [1], [2], [0, 0, 0, 1, 1, 2], [0], [0]>} : vector<1x4x32xbf16>, vector<1x32x128xbf16>, vector<1x4x128xf32> -> vector<1x4x128xf32>
    %cst_92 = arith.constant dense<0xFF800000> : vector<1x128xf32>
    %260 = vector.multi_reduction <maximumf>, %259, %cst_92 [1] : vector<1x4x128xf32> to vector<1x128xf32>
    %261 = vector.shape_cast %260 : vector<1x128xf32> to vector<1x1x128xf32>
    %262 = vector.broadcast %261 : vector<1x1x128xf32> to vector<1x4x128xf32>
    %263 = arith.subf %259, %262 : vector<1x4x128xf32>
    %264 = math.exp %263 : vector<1x4x128xf32>
    %cst_93 = arith.constant dense<0.000000e+00> : vector<1x128xf32>
    %265 = vector.multi_reduction <add>, %264, %cst_93 [1] : vector<1x4x128xf32> to vector<1x128xf32>
    %266 = vector.shape_cast %265 : vector<1x128xf32> to vector<1x1x128xf32>
    %267 = tpu.reciprocal %266 {approx = true} : vector<1x1x128xf32> -> vector<1x1x128xf32>
    %268 = vector.broadcast %267 : vector<1x1x128xf32> to vector<1x4x128xf32>
    %269 = arith.mulf %264, %268 : vector<1x4x128xf32>
    %cst_94 = arith.constant dense<0.000000e+00> : vector<1x4xf32>
    %270 = vector.multi_reduction <add>, %269, %cst_94 [2] : vector<1x4x128xf32> to vector<1x4xf32>
    %271 = vector.shape_cast %270 : vector<1x4xf32> to vector<1x4x1xf32>
    %cst_95 = arith.constant 1.600000e+01 : f32
    %272 = vector.broadcast %cst_95 : f32 to vector<1x4x1xf32>
    %273 = arith.subf %271, %272 : vector<1x4x1xf32>
    %cst_96 = arith.constant 9.99999997E-7 : f32
    %274 = vector.broadcast %cst_96 : f32 to vector<1x4x1xf32>
    %275 = arith.addf %274, %273 : vector<1x4x1xf32>
    %cst_97 = arith.constant 1.000000e+00 : f32
    %276 = vector.broadcast %cst_97 : f32 to vector<1x4x1xf32>
    %277 = arith.divf %276, %275 : vector<1x4x1xf32>
    %278 = vector.broadcast %277 : vector<1x4x1xf32> to vector<1x4x128xf32>
    %279 = arith.mulf %269, %278 : vector<1x4x128xf32>
    %280 = arith.truncf %279 : vector<1x4x128xf32> to vector<1x4x128xbf16>
    %cst_98 = arith.constant dense<0.000000e+00> : vector<1x4x32xf32>
    %281 = tpu.matmul %280, %1, %cst_98 {dimension_numbers = #tpu.dot_dimension_numbers<[2], [1], [1], [2], [0, 0, 0, 1, 1, 2], [0], [0]>} : vector<1x4x128xbf16>, vector<1x128x32xbf16>, vector<1x4x32xf32> -> vector<1x4x32xf32>
    %282 = arith.mulf %281, %281 : vector<1x4x32xf32>
    %cst_99 = arith.constant dense<0.000000e+00> : vector<1x4xf32>
    %283 = vector.multi_reduction <add>, %282, %cst_99 [2] : vector<1x4x32xf32> to vector<1x4xf32>
    %284 = vector.shape_cast %283 : vector<1x4xf32> to vector<1x4x1xf32>
    %285 = math.sqrt %284 : vector<1x4x1xf32>
    %cst_100 = arith.constant 9.99999997E-7 : f32
    %286 = vector.broadcast %cst_100 : f32 to vector<1x4x1xf32>
    %287 = arith.addf %286, %285 : vector<1x4x1xf32>
    %cst_101 = arith.constant 1.000000e+00 : f32
    %288 = vector.broadcast %cst_101 : f32 to vector<1x4x1xf32>
    %289 = arith.divf %288, %287 : vector<1x4x1xf32>
    %290 = vector.broadcast %289 : vector<1x4x1xf32> to vector<1x4x32xf32>
    %291 = arith.mulf %281, %290 : vector<1x4x32xf32>
    %c8_i32 = arith.constant 8 : i32
    %cst_102 = arith.constant 2.000000e+01 : f32
    %292 = vector.broadcast %cst_102 : f32 to vector<1x4x32xf32>
    %293 = arith.mulf %292, %291 : vector<1x4x32xf32>
    %294 = arith.truncf %293 : vector<1x4x32xf32> to vector<1x4x32xbf16>
    %cst_103 = arith.constant dense<0.000000e+00> : vector<1x4x128xf32>
    %295 = tpu.matmul %294, %0, %cst_103 {dimension_numbers = #tpu.dot_dimension_numbers<[2], [1], [1], [2], [0, 0, 0, 1, 1, 2], [0], [0]>} : vector<1x4x32xbf16>, vector<1x32x128xbf16>, vector<1x4x128xf32> -> vector<1x4x128xf32>
    %cst_104 = arith.constant dense<0xFF800000> : vector<1x128xf32>
    %296 = vector.multi_reduction <maximumf>, %295, %cst_104 [1] : vector<1x4x128xf32> to vector<1x128xf32>
    %297 = vector.shape_cast %296 : vector<1x128xf32> to vector<1x1x128xf32>
    %298 = vector.broadcast %297 : vector<1x1x128xf32> to vector<1x4x128xf32>
    %299 = arith.subf %295, %298 : vector<1x4x128xf32>
    %300 = math.exp %299 : vector<1x4x128xf32>
    %cst_105 = arith.constant dense<0.000000e+00> : vector<1x128xf32>
    %301 = vector.multi_reduction <add>, %300, %cst_105 [1] : vector<1x4x128xf32> to vector<1x128xf32>
    %302 = vector.shape_cast %301 : vector<1x128xf32> to vector<1x1x128xf32>
    %303 = tpu.reciprocal %302 {approx = true} : vector<1x1x128xf32> -> vector<1x1x128xf32>
    %304 = vector.broadcast %303 : vector<1x1x128xf32> to vector<1x4x128xf32>
    %305 = arith.mulf %300, %304 : vector<1x4x128xf32>
    %cst_106 = arith.constant dense<0.000000e+00> : vector<1x4xf32>
    %306 = vector.multi_reduction <add>, %305, %cst_106 [2] : vector<1x4x128xf32> to vector<1x4xf32>
    %307 = vector.shape_cast %306 : vector<1x4xf32> to vector<1x4x1xf32>
    %cst_107 = arith.constant 1.600000e+01 : f32
    %308 = vector.broadcast %cst_107 : f32 to vector<1x4x1xf32>
    %309 = arith.subf %307, %308 : vector<1x4x1xf32>
    %cst_108 = arith.constant 9.99999997E-7 : f32
    %310 = vector.broadcast %cst_108 : f32 to vector<1x4x1xf32>
    %311 = arith.addf %310, %309 : vector<1x4x1xf32>
    %cst_109 = arith.constant 1.000000e+00 : f32
    %312 = vector.broadcast %cst_109 : f32 to vector<1x4x1xf32>
    %313 = arith.divf %312, %311 : vector<1x4x1xf32>
    %314 = vector.broadcast %313 : vector<1x4x1xf32> to vector<1x4x128xf32>
    %315 = arith.mulf %305, %314 : vector<1x4x128xf32>
    %316 = arith.truncf %315 : vector<1x4x128xf32> to vector<1x4x128xbf16>
    %cst_110 = arith.constant dense<0.000000e+00> : vector<1x4x32xf32>
    %317 = tpu.matmul %316, %1, %cst_110 {dimension_numbers = #tpu.dot_dimension_numbers<[2], [1], [1], [2], [0, 0, 0, 1, 1, 2], [0], [0]>} : vector<1x4x128xbf16>, vector<1x128x32xbf16>, vector<1x4x32xf32> -> vector<1x4x32xf32>
    %318 = arith.mulf %317, %317 : vector<1x4x32xf32>
    %cst_111 = arith.constant dense<0.000000e+00> : vector<1x4xf32>
    %319 = vector.multi_reduction <add>, %318, %cst_111 [2] : vector<1x4x32xf32> to vector<1x4xf32>
    %320 = vector.shape_cast %319 : vector<1x4xf32> to vector<1x4x1xf32>
    %321 = math.sqrt %320 : vector<1x4x1xf32>
    %cst_112 = arith.constant 9.99999997E-7 : f32
    %322 = vector.broadcast %cst_112 : f32 to vector<1x4x1xf32>
    %323 = arith.addf %322, %321 : vector<1x4x1xf32>
    %cst_113 = arith.constant 1.000000e+00 : f32
    %324 = vector.broadcast %cst_113 : f32 to vector<1x4x1xf32>
    %325 = arith.divf %324, %323 : vector<1x4x1xf32>
    %326 = vector.broadcast %325 : vector<1x4x1xf32> to vector<1x4x32xf32>
    %327 = arith.mulf %317, %326 : vector<1x4x32xf32>
    %cst_114 = arith.constant 2.000000e+01 : f32
    %328 = vector.broadcast %cst_114 : f32 to vector<1x4x32xf32>
    %329 = arith.mulf %328, %327 : vector<1x4x32xf32>
    %330 = arith.truncf %329 : vector<1x4x32xf32> to vector<1x4x32xbf16>
    %cst_115 = arith.constant dense<0.000000e+00> : vector<1x4x128xf32>
    %331 = tpu.matmul %330, %0, %cst_115 {dimension_numbers = #tpu.dot_dimension_numbers<[2], [1], [1], [2], [0, 0, 0, 1, 1, 2], [0], [0]>} : vector<1x4x32xbf16>, vector<1x32x128xbf16>, vector<1x4x128xf32> -> vector<1x4x128xf32>
    %cst_116 = arith.constant dense<0xFF800000> : vector<1x128xf32>
    %332 = vector.multi_reduction <maximumf>, %331, %cst_116 [1] : vector<1x4x128xf32> to vector<1x128xf32>
    %333 = vector.shape_cast %332 : vector<1x128xf32> to vector<1x1x128xf32>
    %334 = vector.broadcast %333 : vector<1x1x128xf32> to vector<1x4x128xf32>
    %335 = arith.subf %331, %334 : vector<1x4x128xf32>
    %336 = math.exp %335 : vector<1x4x128xf32>
    %cst_117 = arith.constant dense<0.000000e+00> : vector<1x128xf32>
    %337 = vector.multi_reduction <add>, %336, %cst_117 [1] : vector<1x4x128xf32> to vector<1x128xf32>
    %338 = vector.shape_cast %337 : vector<1x128xf32> to vector<1x1x128xf32>
    %339 = tpu.reciprocal %338 {approx = true} : vector<1x1x128xf32> -> vector<1x1x128xf32>
    %340 = vector.broadcast %339 : vector<1x1x128xf32> to vector<1x4x128xf32>
    %341 = arith.mulf %336, %340 : vector<1x4x128xf32>
    %cst_118 = arith.constant dense<0.000000e+00> : vector<1x4xf32>
    %342 = vector.multi_reduction <add>, %341, %cst_118 [2] : vector<1x4x128xf32> to vector<1x4xf32>
    %343 = vector.shape_cast %342 : vector<1x4xf32> to vector<1x4x1xf32>
    %cst_119 = arith.constant 1.600000e+01 : f32
    %344 = vector.broadcast %cst_119 : f32 to vector<1x4x1xf32>
    %345 = arith.subf %343, %344 : vector<1x4x1xf32>
    %cst_120 = arith.constant 9.99999997E-7 : f32
    %346 = vector.broadcast %cst_120 : f32 to vector<1x4x1xf32>
    %347 = arith.addf %346, %345 : vector<1x4x1xf32>
    %cst_121 = arith.constant 1.000000e+00 : f32
    %348 = vector.broadcast %cst_121 : f32 to vector<1x4x1xf32>
    %349 = arith.divf %348, %347 : vector<1x4x1xf32>
    %350 = vector.broadcast %349 : vector<1x4x1xf32> to vector<1x4x128xf32>
    %351 = arith.mulf %341, %350 : vector<1x4x128xf32>
    %352 = arith.truncf %351 : vector<1x4x128xf32> to vector<1x4x128xbf16>
    %cst_122 = arith.constant dense<0.000000e+00> : vector<1x4x32xf32>
    %353 = tpu.matmul %352, %1, %cst_122 {dimension_numbers = #tpu.dot_dimension_numbers<[2], [1], [1], [2], [0, 0, 0, 1, 1, 2], [0], [0]>} : vector<1x4x128xbf16>, vector<1x128x32xbf16>, vector<1x4x32xf32> -> vector<1x4x32xf32>
    %354 = arith.mulf %353, %353 : vector<1x4x32xf32>
    %cst_123 = arith.constant dense<0.000000e+00> : vector<1x4xf32>
    %355 = vector.multi_reduction <add>, %354, %cst_123 [2] : vector<1x4x32xf32> to vector<1x4xf32>
    %356 = vector.shape_cast %355 : vector<1x4xf32> to vector<1x4x1xf32>
    %357 = math.sqrt %356 : vector<1x4x1xf32>
    %cst_124 = arith.constant 9.99999997E-7 : f32
    %358 = vector.broadcast %cst_124 : f32 to vector<1x4x1xf32>
    %359 = arith.addf %358, %357 : vector<1x4x1xf32>
    %cst_125 = arith.constant 1.000000e+00 : f32
    %360 = vector.broadcast %cst_125 : f32 to vector<1x4x1xf32>
    %361 = arith.divf %360, %359 : vector<1x4x1xf32>
    %362 = vector.broadcast %361 : vector<1x4x1xf32> to vector<1x4x32xf32>
    %363 = arith.mulf %353, %362 : vector<1x4x32xf32>
    %c0_126 = arith.constant 0 : index
    %c0_127 = arith.constant 0 : index
    %c0_128 = arith.constant 0 : index
    %364 = vector.load %arg4[%c0_126, %c0_127, %c0_128] : memref<1x4x32xf32, #tpu.memory_space<vmem>>, vector<1x4x32xf32>
    tpu.vector_store %arg4[%c0_126, %c0_127, %c0_128], %363 {strides = array<i32>} : memref<1x4x32xf32, #tpu.memory_space<vmem>>, vector<1x4x32xf32>,
    %c0_129 = arith.constant 0 : index
    %c0_130 = arith.constant 0 : index
    %c0_131 = arith.constant 0 : index
    %365 = vector.load %arg5[%c0_129, %c0_130, %c0_131] : memref<1x4x128xf32, #tpu.memory_space<vmem>>, vector<1x4x128xf32>
    tpu.vector_store %arg5[%c0_129, %c0_130, %c0_131], %351 {strides = array<i32>} : memref<1x4x128xf32, #tpu.memory_space<vmem>>, vector<1x4x128xf32>,
    return
  }
  func.func @transform_0(%arg0: i32) -> (i32, i32, i32) {
    %c0_i32 = arith.constant 0 : i32
    %c0_i32_0 = arith.constant 0 : i32
    %c0_i32_1 = arith.constant 0 : i32
    return %arg0, %c0_i32, %c0_i32_0 : i32, i32, i32
  }
  func.func @transform_1(%arg0: i32) -> (i32, i32, i32) {
    %c0_i32 = arith.constant 0 : i32
    %c0_i32_0 = arith.constant 0 : i32
    %c0_i32_1 = arith.constant 0 : i32
    return %arg0, %c0_i32, %c0_i32_0 : i32, i32, i32
  }
  func.func @transform_2(%arg0: i32) -> (i32, i32) {
    %c0_i32 = arith.constant 0 : i32
    %c0_i32_0 = arith.constant 0 : i32
    %c0_i32_1 = arith.constant 0 : i32
    return %c0_i32, %c0_i32_0 : i32, i32
  }
  func.func @transform_3(%arg0: i32) -> (i32, i32, i32) {
    %c0_i32 = arith.constant 0 : i32
    %c0_i32_0 = arith.constant 0 : i32
    %c0_i32_1 = arith.constant 0 : i32
    return %arg0, %c0_i32, %c0_i32_0 : i32, i32, i32
  }
  func.func @transform_4(%arg0: i32) -> (i32, i32, i32) {
    %c0_i32 = arith.constant 0 : i32
    %c0_i32_0 = arith.constant 0 : i32
    %c0_i32_1 = arith.constant 0 : i32
    return %arg0, %c0_i32, %c0_i32_0 : i32, i32, i32
  }
}

</mosaic_0001>

<bundles_post_ra>
// kernel: tpu_custom_call.1
= control target key start
LH: loop header
LB: loop body
LE: loop exit
PB: predicated region body
PF: predicated region fallthrough
CT: control target
= control target key end

     0   :  { %10 = vsyncpa [#allocation3], 0  ;;  %s2964_s0 = inlined_call_operand.vmem [shape: bf16[2,32,128], index: 0, kind: input, shape index: {}]   ;;  %s2965_s1 = inlined_call_operand.vmem [shape: bf16[2,128,32], index: 1, kind: input, shape index: {}]   ;;  %s2966_s2 = inlined_call_operand.vmem [shape: f32[4,32], index: 2, kind: input, shape index: {}]   ;;  %s2967_s3 = inlined_call_operand.hbm [shape: f32[2,4,32], index: 3, kind: output, shape index: {0}]   ;;  %s2968_s4 = inlined_call_operand.hbm [shape: f32[2,4,128], index: 4, kind: output, shape index: {1}]  }
   0x1   :  { %12 = vsyncpa [#allocation3 + $0x1], 0 }
   0x2   :  { %13 = vsyncpa [#allocation5], 0 }
   0x3   :  { %15 = vsyncpa [#allocation5 + $0x1], 0  ;;  %s2468_s15 = smov 0   ;;  %s2470_s16 = smov 0  }
   0x4   :  { %s2472_s17 = smov 0   ;;  %s2474_s18 = smov 0  }
   0x5 LB: > { %s2489_s19 = sadd.s32 4294967295, %s2437_s18   ;;  %s1729_s20 = sadd.s32 4294967294, %s2437_s18   ;;  %s2437_s18 = sphi %s2474_s18, %s2974_s18   ;;  %s2433_s17 = sphi %s2472_s17, %s2973_s17   ;;  %s2429_s16 = sphi %s2470_s16, %s2972_s16   ;;  %s2425_s15 = sphi %s2468_s15, %s2971_s15  }
   0x6   : > { %s2493_s21 = sadd.s32 1, %s2437_s18   ;;  %s101_s22 = sadd.s32 1, %s2433_s17 }
   0x7   : > { %s98_s23 = ssub.s32 %s2437_s18, %s2493_s21  ;;  %p111_p0 = scmp.ne.s32.totalorder %s2433_s17, %s2429_s16 }
   0x8   : > { %p99_p1 = scmp.eq.s32.totalorder %s98_s23, 0  ;;  %p112_p2 = scmp.eq.s32.totalorder %s2489_s19, 1 }
   0x9   : > { %p117_p3 = scmp.ne.s32.totalorder %s2429_s16, %s2425_s15  ;;  %p118_p4 = scmp.eq.s32.totalorder %s1729_s20, 1 }
   0xa   : > { %s2504_s24 = scalar_select %p99_p1, %s2433_s17, %s101_s22  }
   0xb   : > { %p2506_p5 = por %p112_p2, %p111_p0  ;;  %p2510_p6 = por %p118_p4, %p117_p3 }
   0xc   : > { %p1732_p7 = scmp.ge.s32.totalorder %s2437_s18, 1  ;;  %p181_p8 = scmp.lt.s32.totalorder %s2437_s18, 3 }
   0xe   : > { %p182_p9 = pnand %p1732_p7, %p181_p8 }
   0xf   : > { %p217_p10 = scmp.lt.s32.totalorder (!%p182_p9), %s2489_s19, 1  ;;  %v2439_v0 = vmov (!%p182_p9), 0.0   ;;  %vm2440_vm0 = vmmov (!%p182_p9), 0   ;;  %v248_v1 = vld [vmem:[%s2966_s2] sm:$0xf] (!%p182_p9)  ;;  %vm263_vm1 = vcmask (!%p182_p9), 261120  }
  0x10   : > { %185 = sbr.rel (%p182_p9) target bundleno = 8235 (0x202b), region = 32  ;;  %1897 = vmatprep.subr.bf16.mxu1 (!%p182_p9), %v2439_v0  ;;  %1901 = vmatprep.mubr.msk.bf16.mxu1 (!%p182_p9), %vm2440_vm0, %v2439_v0  ;;  %v249_v4 = vmul.f32 (!%p182_p9), 20.0, %v248_v1  ;;  %vm307_vm2 = vcmask (!%p182_p9), 1043456   ;;  %vm425_vm3 = vcmask (!%p182_p9), 257024   ;;  %s2881_s12 = sand.u32 (!%p182_p9), 1, %s2429_s16  }
  0x11   : > { %1925 = vmatprep.subr.bf16.mxu0 (!%p182_p9), %v2439_v0  ;;  %1929 = vmatprep.mubr.msk.bf16.mxu0 (!%p182_p9), %vm2440_vm0, %v2439_v0  ;;  %s1733_s13 = sshll.u32 (!%p182_p9), %s2881_s12, 2  ;;  %s1771_s20 = sshll.u32 (!%p182_p9), %s2489_s19, 6 }
  0x12   : > { %v250_v5 = vpack.c.bf16 (!%p182_p9), %v249_v4, %v249_v4  ;;  %s216_s14 = scalar_lea.vmem (!%p182_p9), [#allocation4], %s1733_s13  ;;  %s2441_s5 = smov (!%p182_p9), [#allocation4]  }
  0x13   : > { %s2347_s6 = sshll.u32 (!%p182_p9), %s2441_s5, 4  ;;  %s2348_s6 = int_to_ptr.vmem [resolvable:$false] %s2347_s6 }
  0x14   : > { %s2349_s7 = scalar_lea.vmem (!%p182_p9), %s2348_s6, 128 }
  0x17   : > { %s218_s27 = scalar_select %p217_p10, %s2489_s19, 1 }
  0x19   : > { %s1775_s28 = sshll.u32 %s218_s27, 4  ;;  %s1776_s29 = sshll.u32 %s218_s27, 6 }
  0x1a   : > { %s2530_s8 = scalar_lea.vmem %s2964_s0, %s1775_s28  ;;  %s2538_s11 = scalar_lea.vmem %s2965_s1, %s1776_s29 }
  0x1b   : > { %v2533_v2 = vld [vmem:[%s2530_s8] sm:$0xff]   ;;  %v2541_v3 = vld [vmem:[%s2530_s8 + $0x8] sm:$0xff]   ;;  %v2564_v8 = vld [vmem:[%s2538_s11 + $0x10] sm:$0xff]   ;;  %s2893_s27 = scalar_lea.hbm %s2968_s4, %s1771_s20  ;;  %s1626_s28 = sshll.u32 %s216_s14, 4  ;;  %s1627_s28 = int_to_ptr.vmem [resolvable:$true] %s1626_s28 }
  0x1c   : > { %1898 = vmatpush3.bf16.msra.mxu1 %v2533_v2  ;;  %1926 = vmatpush3.bf16.msra.mxu0 %v2533_v2  ;;  %v2555_v6 = vld [vmem:[%s2538_s11] sm:$0xff]   ;;  %v2559_v7 = vld [vmem:[%s2538_s11 + $0x8] sm:$0xff]   ;;  %v2573_v33 = vld [vmem:[%s2538_s11 + $0x18] sm:$0xff]   ;;  %s1600_s29 = scalar_lea.sflag [#allocation5], %s2881_s12  ;;  %s2343_s30 = scalar_lea.vmem %s1627_s28, 64 }
  0x1d   : > { %1899 = vmatprep.subr.bf16.mxu1 %v2439_v0  ;;  %1927 = vmatprep.subr.bf16.mxu0 %v2439_v0  ;;  %v2578_v34 = vld [vmem:[%s2538_s11 + $0x20] sm:$0xff]   ;;  %v2582_v35 = vld [vmem:[%s2538_s11 + $0x28] sm:$0xff]   ;;  %v2587_v36 = vld [vmem:[%s2538_s11 + $0x30] sm:$0xff]   ;;  %p2344_p11 = scmp.ne.s32.totalorder %s1627_s28, %s2343_s30  ;;  %p2350_p0 = scmp.lt.s32.totalorder %s1627_s28, %s2348_s6 }
  0x1e   : > { %v2592_v37 = vld [vmem:[%s2538_s11 + $0x38] sm:$0xff]   ;;  %p2351_p1 = scmp.lt.s32.totalorder %s2349_s7, %s2343_s30 }
  0x1f   : > { %p2345_p12 = pnand %p2344_p11, %p2506_p5 }
  0x20   : > { %1900 = vmatpush3.bf16.msra.mxu1 %v2541_v3  ;;  %1928 = vmatpush3.bf16.msra.mxu0 %v2541_v3  ;;  %p2352_p2 = por %p2351_p1, %p2350_p0 }
  0x21   : > { %1905 = vmatprep.subr.bf16.mxu1 %v2439_v0  ;;  %1933 = vmatprep.subr.bf16.mxu0 %v2439_v0  ;;  %p2346_p13 = pneg %p2345_p12 }
  0x23   : > { %1902 = vmatmul.mubr.msk.bf16.vlgmr.msra.gmra.mrb[0].mxu1 %vm263_vm1, %v250_v5  ;;  %p2353_p3 = pnand %p2352_p2, %p2346_p13 }
  0x24   : > { %1921 = vmatprep.mubr.msk.bf16.mxu1 %vm2440_vm0, %v2439_v0  ;;  %1906 = vmatpush3.bf16.msra.mxu1 %v2555_v6 }
  0x25   : > { %1907 = vmatprep.subr.bf16.mxu1 %v2439_v0 }
  0x28   : > { %1908 = vmatpush3.bf16.msra.mxu1 %v2559_v7 }
  0x29   : > { %1909 = vmatprep.subr.bf16.mxu1 %v2439_v0 }
  0x2c   : > { %1910 = vmatpush3.bf16.msra.mxu1 %v2564_v8 }
  0x2d   : > { %1911 = vmatprep.subr.bf16.mxu1 %v2439_v0 }
  0x30   : > { %1912 = vmatpush3.bf16.msra.mxu1 %v2573_v33 }
  0x31   : > { %1913 = vmatprep.subr.bf16.mxu1 %v2439_v0 }
  0x34   : > { %1914 = vmatpush3.bf16.msra.mxu1 %v2578_v34 }
  0x35   : > { %1915 = vmatprep.subr.bf16.mxu1 %v2439_v0 }
  0x38   : > { %1916 = vmatpush3.bf16.msra.mxu1 %v2582_v35 }
  0x39   : > { %1917 = vmatprep.subr.bf16.mxu1 %v2439_v0 }
  0x3c   : > { %1918 = vmatpush3.bf16.msra.mxu1 %v2587_v36 }
  0x3d   : > { %1919 = vmatprep.subr.bf16.mxu1 %v2439_v0 }
  0x40   : > { %1920 = vmatpush3.bf16.msra.mxu1 %v2592_v37 }
  0x41   : > { %1953 = vmatprep.subr.bf16.mxu1 %v2439_v0 }
  0xf6   : > { %v301_v9 = vpop.f32.mrb[0].mxu1 }
  0xf7   : > { %v308_v10 = vsel %vm307_vm2, %v301_v9, -inf  ;;  %v1903_v11 = vpop.f32.mrb[1].mxu1 }
  0xf8   : > { %v309_v12 = vrot.slane %v308_v10, 4  ;;  %v304_v13 = vpop.f32.mrb[2].mxu1 }
  0xf9   : > { %v1904_v14 = vpop.f32.mrb[3].mxu1 }
  0xfa   : > { %v310_v15 = vmax.f32 %v308_v10, %v309_v12 }
  0xfc   : > { %v311_v16 = vrot.slane %v310_v15, 2 }
  0xfe   : > { %v312_v17 = vmax.f32 %v310_v15, %v311_v16 }
 0x100   : > { %v313_v18 = vrot.slane %v312_v17, 1 }
 0x102   : > { %v314_v19 = vmax.f32 %v312_v17, %v313_v18 }
 0x104   : > { %v315_v20 = vsub.f32 %v301_v9, %v314_v19 }
 0x106   : > { %v316_v21 = vmul.f32 1.442695, %v315_v20 }
 0x108   : > { %2233 = vpow2.f32 %v316_v21 }
 0x112   : > { %v2234_v22 = vpop.eup %2233 }
 0x113   : > { %v318_v23 = vsel %vm307_vm2, %v2234_v22, 0.0 }
 0x114   : > { %v319_v24 = vrot.slane %v318_v23, 4 }
 0x116   : > { %v320_v25 = vadd.f32 %v319_v24, %v318_v23 }
 0x118   : > { %v321_v26 = vrot.slane %v320_v25, 2 }
 0x11a   : > { %v322_v27 = vadd.f32 %v321_v26, %v320_v25 }
 0x11c   : > { %v323_v28 = vrot.slane %v322_v27, 1 }
 0x11e   : > { %v324_v29 = vadd.f32 %v323_v28, %v322_v27 }
 0x120   : > { %2235 = vrcp.f32 %v324_v29 }
 0x12a   : > { %v2236_v30 = vpop.eup %2235 }
 0x12b   : > { %v326_v31 = vmul.f32 %v2236_v30, %v2234_v22 }
 0x12d   : > { %v327_v32 = vsel %vm307_vm2, %v326_v31, 0.0 }
 0x12e   : > { %328 = vadd.xlane.f32.xlu0 %v327_v32 }
 0x1bb   : > { %v329_v38 = vpop.xlane.xlu0 %328 }
 0x1bc   : > { %v1742_v39 = vadd.f32 -16.0, %v329_v38 }
 0x1be   : > { %v331_v40 = vadd.f32 1e-06, %v1742_v39 }
 0x1c0   : > { %2237 = vrcp.f32 %v331_v40 }
 0x1ca   : > { %v2238_v41 = vpop.eup %2237 }
 0x1cb   : > { %v334_v42 = vmul.f32 %v2238_v41, %v326_v31 }
 0x1cd   : > { %v335_v43 = vpack.c.bf16 %v334_v42, %v334_v42 }
 0x1cf   : > { %1922 = vmatmul.mubr.bf16.vlgmr.msra.gmra.mrb[4].mxu1 %v335_v43 }
 0x1d0   : > { %1954 = vmatpush3.bf16.msra.mxu1 %v2533_v2  ;;  %1957 = vmatprep.mubr.msk.bf16.mxu1 %vm2440_vm0, %v2439_v0 }
 0x1d1   : > { %1955 = vmatprep.subr.bf16.mxu1 %v2439_v0 }
 0x1d4   : > { %1956 = vmatpush3.bf16.msra.mxu1 %v2541_v3 }
 0x1d5   : > { %1961 = vmatprep.subr.bf16.mxu1 %v2439_v0 }
 0x2a2   : > { %v418_v44 = vpop.f32.mrb[4].mxu1 }
 0x2a3   : > { %v424_v45 = vmul.f32 %v418_v44, %v418_v44  ;;  %v1923_v46 = vpop.f32.mrb[5].mxu1 }
 0x2a4   : > { %v421_v47 = vpop.f32.mrb[6].mxu1 }
 0x2a5   : > { %v1924_v48 = vpop.f32.mrb[7].mxu1  ;;  %v426_v49 = vsel %vm425_vm3, %v424_v45, 0.0 }
 0x2a6   : > { %427 = vadd.xlane.f32.xlu0 %v426_v49 }
 0x333   : > { %v428_v50 = vpop.xlane.xlu0 %427 }
 0x334   : > { %2239 = vrsqrt.f32 %v428_v50  ;;  %vm431_vm4 = vcmp.eq.f32.partialorder %v428_v50, inf  ;;  %v434_v53 = vand.u32 2147483648, %v428_v50  ;;  %vm433_vm5 = vcmp.eq.f32.partialorder %v428_v50, 0.0 }
 0x33e   : > { %v2240_v51 = vpop.eup %2239 }
 0x33f   : > { %v430_v52 = vmul.f32 %v2240_v51, %v428_v50 }
 0x341   : > { %v432_v54 = vsel %vm431_vm4, %v428_v50, %v430_v52 }
 0x342   : > { %v435_v55 = vsel %vm433_vm5, %v434_v53, %v432_v54 }
 0x343   : > { %v436_v56 = vadd.f32 1e-06, %v435_v55 }
 0x345   : > { %2241 = vrcp.f32 %v436_v56 }
 0x34f   : > { %v2242_v57 = vpop.eup %2241 }
 0x350   : > { %v439_v58 = vmul.f32 %v2242_v57, %v418_v44 }
 0x352   : > { %v440_v59 = vmul.f32 20.0, %v439_v58 }
 0x354   : > { %v441_v60 = vpack.c.bf16 %v440_v59, %v440_v59 }
 0x356   : > { %1930 = vmatmul.mubr.msk.bf16.vlgmr.msra.gmra.mrb[0].mxu0 %vm263_vm1, %v441_v60 }
 0x357   : > { %1934 = vmatpush3.bf16.msra.mxu0 %v2555_v6  ;;  %1949 = vmatprep.mubr.msk.bf16.mxu0 %vm2440_vm0, %v2439_v0 }
 0x358   : > { %1935 = vmatprep.subr.bf16.mxu0 %v2439_v0 }
 0x35b   : > { %1936 = vmatpush3.bf16.msra.mxu0 %v2559_v7 }
 0x35c   : > { %1937 = vmatprep.subr.bf16.mxu0 %v2439_v0 }
 0x35f   : > { %1938 = vmatpush3.bf16.msra.mxu0 %v2564_v8 }
 0x360   : > { %1939 = vmatprep.subr.bf16.mxu0 %v2439_v0 }
 0x363   : > { %1940 = vmatpush3.bf16.msra.mxu0 %v2573_v33 }
 0x364   : > { %1941 = vmatprep.subr.bf16.mxu0 %v2439_v0 }
 0x367   : > { %1942 = vmatpush3.bf16.msra.mxu0 %v2578_v34 }
 0x368   : > { %1943 = vmatprep.subr.bf16.mxu0 %v2439_v0 }
 0x36b   : > { %1944 = vmatpush3.bf16.msra.mxu0 %v2582_v35 }
 0x36c   : > { %1945 = vmatprep.subr.bf16.mxu0 %v2439_v0 }
 0x36f   : > { %1946 = vmatpush3.bf16.msra.mxu0 %v2587_v36 }
 0x370   : > { %1947 = vmatprep.subr.bf16.mxu0 %v2439_v0 }
 0x373   : > { %1948 = vmatpush3.bf16.msra.mxu0 %v2592_v37 }
 0x374   : > { %1981 = vmatprep.subr.bf16.mxu0 %v2439_v0 }
 0x429   : > { %v479_v61 = vpop.f32.mrb[0].mxu0 }
 0x42a   : > { %v485_v62 = vsel %vm307_vm2, %v479_v61, -inf  ;;  %v1931_v63 = vpop.f32.mrb[1].mxu0 }
 0x42b   : > { %v486_v1 = vrot.slane %v485_v62, 4  ;;  %v482_v4 = vpop.f32.mrb[2].mxu0 }
 0x42c   : > { %v1932_v5 = vpop.f32.mrb[3].mxu0 }
 0x42d   : > { %v487_v9 = vmax.f32 %v485_v62, %v486_v1 }
 0x42f   : > { %v488_v10 = vrot.slane %v487_v9, 2 }
 0x431   : > { %v489_v11 = vmax.f32 %v487_v9, %v488_v10 }
 0x433   : > { %v490_v12 = vrot.slane %v489_v11, 1 }
 0x435   : > { %v491_v13 = vmax.f32 %v489_v11, %v490_v12 }
 0x437   : > { %v492_v14 = vsub.f32 %v479_v61, %v491_v13 }
 0x439   : > { %v493_v15 = vmul.f32 1.442695, %v492_v14 }
 0x43b   : > { %2243 = vpow2.f32 %v493_v15 }
 0x445   : > { %v2244_v16 = vpop.eup %2243 }
 0x446   : > { %v495_v17 = vsel %vm307_vm2, %v2244_v16, 0.0 }
 0x447   : > { %v496_v18 = vrot.slane %v495_v17, 4 }
 0x449   : > { %v497_v19 = vadd.f32 %v496_v18, %v495_v17 }
 0x44b   : > { %v498_v20 = vrot.slane %v497_v19, 2 }
 0x44d   : > { %v499_v21 = vadd.f32 %v498_v20, %v497_v19 }
 0x44f   : > { %v500_v22 = vrot.slane %v499_v21, 1 }
 0x451   : > { %v501_v23 = vadd.f32 %v500_v22, %v499_v21 }
 0x453   : > { %2245 = vrcp.f32 %v501_v23 }
 0x45d   : > { %v2246_v24 = vpop.eup %2245 }
 0x45e   : > { %v503_v25 = vmul.f32 %v2246_v24, %v2244_v16 }
 0x460   : > { %v504_v26 = vsel %vm307_vm2, %v503_v25, 0.0 }
 0x461   : > { %505 = vadd.xlane.f32.xlu1 %v504_v26 }
 0x4ee   : > { %v506_v27 = vpop.xlane.xlu1 %505 }
 0x4ef   : > { %v1752_v28 = vadd.f32 -16.0, %v506_v27 }
 0x4f1   : > { %v508_v29 = vadd.f32 1e-06, %v1752_v28 }
 0x4f3   : > { %2247 = vrcp.f32 %v508_v29 }
 0x4fd   : > { %v2248_v30 = vpop.eup %2247 }
 0x4fe   : > { %v511_v31 = vmul.f32 %v2248_v30, %v503_v25 }
 0x500   : > { %v512_v32 = vpack.c.bf16 %v511_v31, %v511_v31 }
 0x502   : > { %1950 = vmatmul.mubr.bf16.vlgmr.msra.gmra.mrb[4].mxu0 %v512_v32 }
 0x503   : > { %1982 = vmatpush3.bf16.msra.mxu0 %v2533_v2  ;;  %1985 = vmatprep.mubr.msk.bf16.mxu0 %vm2440_vm0, %v2439_v0 }
 0x504   : > { %1983 = vmatprep.subr.bf16.mxu0 %v2439_v0 }
 0x507   : > { %1984 = vmatpush3.bf16.msra.mxu0 %v2541_v3 }
 0x508   : > { %1989 = vmatprep.subr.bf16.mxu0 %v2439_v0 }
 0x5d5   : > { %v547_v38 = vpop.f32.mrb[4].mxu0 }
 0x5d6   : > { %v553_v39 = vmul.f32 %v547_v38, %v547_v38  ;;  %v1951_v40 = vpop.f32.mrb[5].mxu0 }
 0x5d7   : > { %v550_v41 = vpop.f32.mrb[6].mxu0 }
 0x5d8   : > { %v1952_v42 = vpop.f32.mrb[7].mxu0  ;;  %v554_v43 = vsel %vm425_vm3, %v553_v39, 0.0 }
 0x5d9   : > { %555 = vadd.xlane.f32.xlu1 %v554_v43 }
 0x666   : > { %v556_v44 = vpop.xlane.xlu1 %555 }
 0x667   : > { %2249 = vrsqrt.f32 %v556_v44  ;;  %vm559_vm6 = vcmp.eq.f32.partialorder %v556_v44, inf  ;;  %v562_v47 = vand.u32 2147483648, %v556_v44  ;;  %vm561_vm7 = vcmp.eq.f32.partialorder %v556_v44, 0.0 }
 0x671   : > { %v2250_v45 = vpop.eup %2249 }
 0x672   : > { %v558_v46 = vmul.f32 %v2250_v45, %v556_v44 }
 0x674   : > { %v560_v48 = vsel %vm559_vm6, %v556_v44, %v558_v46 }
 0x675   : > { %v563_v49 = vsel %vm561_vm7, %v562_v47, %v560_v48 }
 0x676   : > { %v564_v50 = vadd.f32 1e-06, %v563_v49 }
 0x678   : > { %2251 = vrcp.f32 %v564_v50 }
 0x682   : > { %v2252_v51 = vpop.eup %2251 }
 0x683   : > { %v567_v52 = vmul.f32 %v2252_v51, %v547_v38 }
 0x685   : > { %v568_v53 = vmul.f32 20.0, %v567_v52 }
 0x687   : > { %v569_v54 = vpack.c.bf16 %v568_v53, %v568_v53 }
 0x689   : > { %1958 = vmatmul.mubr.msk.bf16.vlgmr.msra.gmra.mrb[8].mxu1 %vm263_vm1, %v569_v54 }
 0x68a   : > { %1962 = vmatpush3.bf16.msra.mxu1 %v2555_v6  ;;  %1977 = vmatprep.mubr.msk.bf16.mxu1 %vm2440_vm0, %v2439_v0 }
 0x68b   : > { %1963 = vmatprep.subr.bf16.mxu1 %v2439_v0 }
 0x68e   : > { %1964 = vmatpush3.bf16.msra.mxu1 %v2559_v7 }
 0x68f   : > { %1965 = vmatprep.subr.bf16.mxu1 %v2439_v0 }
 0x692   : > { %1966 = vmatpush3.bf16.msra.mxu1 %v2564_v8 }
 0x693   : > { %1967 = vmatprep.subr.bf16.mxu1 %v2439_v0 }
 0x696   : > { %1968 = vmatpush3.bf16.msra.mxu1 %v2573_v33 }
 0x697   : > { %1969 = vmatprep.subr.bf16.mxu1 %v2439_v0 }
 0x69a   : > { %1970 = vmatpush3.bf16.msra.mxu1 %v2578_v34 }
 0x69b   : > { %1971 = vmatprep.subr.bf16.mxu1 %v2439_v0 }
 0x69e   : > { %1972 = vmatpush3.bf16.msra.mxu1 %v2582_v35 }
 0x69f   : > { %1973 = vmatprep.subr.bf16.mxu1 %v2439_v0 }
 0x6a2   : > { %1974 = vmatpush3.bf16.msra.mxu1 %v2587_v36 }
 0x6a3   : > { %1975 = vmatprep.subr.bf16.mxu1 %v2439_v0 }
 0x6a6   : > { %1976 = vmatpush3.bf16.msra.mxu1 %v2592_v37 }
 0x6a7   : > { %2009 = vmatprep.subr.bf16.mxu1 %v2439_v0 }
 0x75c   : > { %v607_v55 = vpop.f32.mrb[8].mxu1 }
 0x75d   : > { %v613_v56 = vsel %vm307_vm2, %v607_v55, -inf  ;;  %v1959_v57 = vpop.f32.mrb[9].mxu1 }
 0x75e   : > { %v614_v58 = vrot.slane %v613_v56, 4  ;;  %v610_v59 = vpop.f32.mrb[10].mxu1 }
 0x75f   : > { %v1960_v60 = vpop.f32.mrb[11].mxu1 }
 0x760   : > { %v615_v61 = vmax.f32 %v613_v56, %v614_v58 }
 0x762   : > { %v616_v62 = vrot.slane %v615_v61, 2 }
 0x764   : > { %v617_v63 = vmax.f32 %v615_v61, %v616_v62 }
 0x766   : > { %v618_v1 = vrot.slane %v617_v63, 1 }
 0x768   : > { %v619_v4 = vmax.f32 %v617_v63, %v618_v1 }
 0x76a   : > { %v620_v5 = vsub.f32 %v607_v55, %v619_v4 }
 0x76c   : > { %v621_v9 = vmul.f32 1.442695, %v620_v5 }
 0x76e   : > { %2253 = vpow2.f32 %v621_v9 }
 0x778   : > { %v2254_v10 = vpop.eup %2253 }
 0x779   : > { %v623_v11 = vsel %vm307_vm2, %v2254_v10, 0.0 }
 0x77a   : > { %v624_v12 = vrot.slane %v623_v11, 4 }
 0x77c   : > { %v625_v13 = vadd.f32 %v624_v12, %v623_v11 }
 0x77e   : > { %v626_v14 = vrot.slane %v625_v13, 2 }
 0x780   : > { %v627_v15 = vadd.f32 %v626_v14, %v625_v13 }
 0x782   : > { %v628_v16 = vrot.slane %v627_v15, 1 }
 0x784   : > { %v629_v17 = vadd.f32 %v628_v16, %v627_v15 }
 0x786   : > { %2255 = vrcp.f32 %v629_v17 }
 0x790   : > { %v2256_v18 = vpop.eup %2255 }
 0x791   : > { %v631_v19 = vmul.f32 %v2256_v18, %v2254_v10 }
 0x793   : > { %v632_v20 = vsel %vm307_vm2, %v631_v19, 0.0 }
 0x794   : > { %633 = vadd.xlane.f32.xlu0 %v632_v20 }
 0x821   : > { %v634_v21 = vpop.xlane.xlu0 %633 }
 0x822   : > { %v1754_v22 = vadd.f32 -16.0, %v634_v21 }
 0x824   : > { %v636_v23 = vadd.f32 1e-06, %v1754_v22 }
 0x826   : > { %2257 = vrcp.f32 %v636_v23 }
 0x830   : > { %v2258_v24 = vpop.eup %2257 }
 0x831   : > { %v639_v25 = vmul.f32 %v2258_v24, %v631_v19 }
 0x833   : > { %v640_v26 = vpack.c.bf16 %v639_v25, %v639_v25 }
 0x835   : > { %1978 = vmatmul.mubr.bf16.vlgmr.msra.gmra.mrb[12].mxu1 %v640_v26 }
 0x836   : > { %2010 = vmatpush3.bf16.msra.mxu1 %v2533_v2  ;;  %2013 = vmatprep.mubr.msk.bf16.mxu1 %vm2440_vm0, %v2439_v0 }
 0x837   : > { %2011 = vmatprep.subr.bf16.mxu1 %v2439_v0 }
 0x83a   : > { %2012 = vmatpush3.bf16.msra.mxu1 %v2541_v3 }
 0x83b   : > { %2017 = vmatprep.subr.bf16.mxu1 %v2439_v0 }
 0x908   : > { %v675_v27 = vpop.f32.mrb[12].mxu1 }
 0x909   : > { %v681_v28 = vmul.f32 %v675_v27, %v675_v27  ;;  %v1979_v29 = vpop.f32.mrb[13].mxu1 }
 0x90a   : > { %v678_v30 = vpop.f32.mrb[14].mxu1 }
 0x90b   : > { %v1980_v31 = vpop.f32.mrb[15].mxu1  ;;  %v682_v32 = vsel %vm425_vm3, %v681_v28, 0.0 }
 0x90c   : > { %683 = vadd.xlane.f32.xlu1 %v682_v32 }
 0x999   : > { %v684_v38 = vpop.xlane.xlu1 %683 }
 0x99a   : > { %2259 = vrsqrt.f32 %v684_v38  ;;  %vm687_vm8 = vcmp.eq.f32.partialorder %v684_v38, inf  ;;  %v690_v41 = vand.u32 2147483648, %v684_v38  ;;  %vm689_vm9 = vcmp.eq.f32.partialorder %v684_v38, 0.0 }
 0x9a4   : > { %v2260_v39 = vpop.eup %2259 }
 0x9a5   : > { %v686_v40 = vmul.f32 %v2260_v39, %v684_v38 }
 0x9a7   : > { %v688_v42 = vsel %vm687_vm8, %v684_v38, %v686_v40 }
 0x9a8   : > { %v691_v43 = vsel %vm689_vm9, %v690_v41, %v688_v42 }
 0x9a9   : > { %v692_v44 = vadd.f32 1e-06, %v691_v43 }
 0x9ab   : > { %2261 = vrcp.f32 %v692_v44 }
 0x9b5   : > { %v2262_v45 = vpop.eup %2261 }
 0x9b6   : > { %v695_v46 = vmul.f32 %v2262_v45, %v675_v27 }
 0x9b8   : > { %v696_v47 = vmul.f32 20.0, %v695_v46 }
 0x9ba   : > { %v697_v48 = vpack.c.bf16 %v696_v47, %v696_v47 }
 0x9bc   : > { %1986 = vmatmul.mubr.msk.bf16.vlgmr.msra.gmra.mrb[8].mxu0 %vm263_vm1, %v697_v48 }
 0x9bd   : > { %1990 = vmatpush3.bf16.msra.mxu0 %v2555_v6  ;;  %2005 = vmatprep.mubr.msk.bf16.mxu0 %vm2440_vm0, %v2439_v0 }
 0x9be   : > { %1991 = vmatprep.subr.bf16.mxu0 %v2439_v0 }
 0x9c1   : > { %1992 = vmatpush3.bf16.msra.mxu0 %v2559_v7 }
 0x9c2   : > { %1993 = vmatprep.subr.bf16.mxu0 %v2439_v0 }
 0x9c5   : > { %1994 = vmatpush3.bf16.msra.mxu0 %v2564_v8 }
 0x9c6   : > { %1995 = vmatprep.subr.bf16.mxu0 %v2439_v0 }
 0x9c9   : > { %1996 = vmatpush3.bf16.msra.mxu0 %v2573_v33 }
 0x9ca   : > { %1997 = vmatprep.subr.bf16.mxu0 %v2439_v0 }
 0x9cd   : > { %1998 = vmatpush3.bf16.msra.mxu0 %v2578_v34 }
 0x9ce   : > { %1999 = vmatprep.subr.bf16.mxu0 %v2439_v0 }
 0x9d1   : > { %2000 = vmatpush3.bf16.msra.mxu0 %v2582_v35 }
 0x9d2   : > { %2001 = vmatprep.subr.bf16.mxu0 %v2439_v0 }
 0x9d5   : > { %2002 = vmatpush3.bf16.msra.mxu0 %v2587_v36 }
 0x9d6   : > { %2003 = vmatprep.subr.bf16.mxu0 %v2439_v0 }
 0x9d9   : > { %2004 = vmatpush3.bf16.msra.mxu0 %v2592_v37 }
 0x9da   : > { %2037 = vmatprep.subr.bf16.mxu0 %v2439_v0 }
 0xa8f   : > { %v735_v49 = vpop.f32.mrb[8].mxu0 }
 0xa90   : > { %v741_v50 = vsel %vm307_vm2, %v735_v49, -inf  ;;  %v1987_v51 = vpop.f32.mrb[9].mxu0 }
 0xa91   : > { %v742_v52 = vrot.slane %v741_v50, 4  ;;  %v738_v53 = vpop.f32.mrb[10].mxu0 }
 0xa92   : > { %v1988_v54 = vpop.f32.mrb[11].mxu0 }
 0xa93   : > { %v743_v55 = vmax.f32 %v741_v50, %v742_v52 }
 0xa95   : > { %v744_v56 = vrot.slane %v743_v55, 2 }
 0xa97   : > { %v745_v57 = vmax.f32 %v743_v55, %v744_v56 }
 0xa99   : > { %v746_v58 = vrot.slane %v745_v57, 1 }
 0xa9b   : > { %v747_v59 = vmax.f32 %v745_v57, %v746_v58 }
 0xa9d   : > { %v748_v60 = vsub.f32 %v735_v49, %v747_v59 }
 0xa9f   : > { %v749_v61 = vmul.f32 1.442695, %v748_v60 }
 0xaa1   : > { %2263 = vpow2.f32 %v749_v61 }
 0xaab   : > { %v2264_v62 = vpop.eup %2263 }
 0xaac   : > { %v751_v63 = vsel %vm307_vm2, %v2264_v62, 0.0 }
 0xaad   : > { %v752_v1 = vrot.slane %v751_v63, 4 }
 0xaaf   : > { %v753_v4 = vadd.f32 %v752_v1, %v751_v63 }
 0xab1   : > { %v754_v5 = vrot.slane %v753_v4, 2 }
 0xab3   : > { %v755_v9 = vadd.f32 %v754_v5, %v753_v4 }
 0xab5   : > { %v756_v10 = vrot.slane %v755_v9, 1 }
 0xab7   : > { %v757_v11 = vadd.f32 %v756_v10, %v755_v9 }
 0xab9   : > { %2265 = vrcp.f32 %v757_v11 }
 0xac3   : > { %v2266_v12 = vpop.eup %2265 }
 0xac4   : > { %v759_v13 = vmul.f32 %v2266_v12, %v2264_v62 }
 0xac6   : > { %v760_v14 = vsel %vm307_vm2, %v759_v13, 0.0 }
 0xac7   : > { %761 = vadd.xlane.f32.xlu0 %v760_v14 }
 0xb54   : > { %v762_v15 = vpop.xlane.xlu0 %761 }
 0xb55   : > { %v1756_v16 = vadd.f32 -16.0, %v762_v15 }
 0xb57   : > { %v764_v17 = vadd.f32 1e-06, %v1756_v16 }
 0xb59   : > { %2267 = vrcp.f32 %v764_v17 }
 0xb63   : > { %v2268_v18 = vpop.eup %2267 }
 0xb64   : > { %v767_v19 = vmul.f32 %v2268_v18, %v759_v13 }
 0xb66   : > { %v768_v20 = vpack.c.bf16 %v767_v19, %v767_v19 }
 0xb68   : > { %2006 = vmatmul.mubr.bf16.vlgmr.msra.gmra.mrb[12].mxu0 %v768_v20 }
 0xb69   : > { %2038 = vmatpush3.bf16.msra.mxu0 %v2533_v2  ;;  %2041 = vmatprep.mubr.msk.bf16.mxu0 %vm2440_vm0, %v2439_v0 }
 0xb6a   : > { %2039 = vmatprep.subr.bf16.mxu0 %v2439_v0 }
 0xb6d   : > { %2040 = vmatpush3.bf16.msra.mxu0 %v2541_v3 }
 0xb6e   : > { %2045 = vmatprep.subr.bf16.mxu0 %v2439_v0 }
 0xc3b   : > { %v803_v21 = vpop.f32.mrb[12].mxu0 }
 0xc3c   : > { %v809_v22 = vmul.f32 %v803_v21, %v803_v21  ;;  %v2007_v23 = vpop.f32.mrb[13].mxu0 }
 0xc3d   : > { %v806_v24 = vpop.f32.mrb[14].mxu0 }
 0xc3e   : > { %v2008_v25 = vpop.f32.mrb[15].mxu0  ;;  %v810_v26 = vsel %vm425_vm3, %v809_v22, 0.0 }
 0xc3f   : > { %811 = vadd.xlane.f32.xlu1 %v810_v26 }
 0xccc   : > { %v812_v27 = vpop.xlane.xlu1 %811 }
 0xccd   : > { %2269 = vrsqrt.f32 %v812_v27  ;;  %vm815_vm10 = vcmp.eq.f32.partialorder %v812_v27, inf  ;;  %v818_v30 = vand.u32 2147483648, %v812_v27  ;;  %vm817_vm11 = vcmp.eq.f32.partialorder %v812_v27, 0.0 }
 0xcd7   : > { %v2270_v28 = vpop.eup %2269 }
 0xcd8   : > { %v814_v29 = vmul.f32 %v2270_v28, %v812_v27 }
 0xcda   : > { %v816_v31 = vsel %vm815_vm10, %v812_v27, %v814_v29 }
 0xcdb   : > { %v819_v32 = vsel %vm817_vm11, %v818_v30, %v816_v31 }
 0xcdc   : > { %v820_v38 = vadd.f32 1e-06, %v819_v32 }
 0xcde   : > { %2271 = vrcp.f32 %v820_v38 }
 0xce8   : > { %v2272_v39 = vpop.eup %2271 }
 0xce9   : > { %v823_v40 = vmul.f32 %v2272_v39, %v803_v21 }
 0xceb   : > { %v824_v41 = vmul.f32 20.0, %v823_v40 }
 0xced   : > { %v825_v42 = vpack.c.bf16 %v824_v41, %v824_v41 }
 0xcef   : > { %2014 = vmatmul.mubr.msk.bf16.vlgmr.msra.gmra.mrb[16].mxu1 %vm263_vm1, %v825_v42 }
 0xcf0   : > { %2018 = vmatpush3.bf16.msra.mxu1 %v2555_v6  ;;  %2033 = vmatprep.mubr.msk.bf16.mxu1 %vm2440_vm0, %v2439_v0 }
 0xcf1   : > { %2019 = vmatprep.subr.bf16.mxu1 %v2439_v0 }
 0xcf4   : > { %2020 = vmatpush3.bf16.msra.mxu1 %v2559_v7 }
 0xcf5   : > { %2021 = vmatprep.subr.bf16.mxu1 %v2439_v0 }
 0xcf8   : > { %2022 = vmatpush3.bf16.msra.mxu1 %v2564_v8 }
 0xcf9   : > { %2023 = vmatprep.subr.bf16.mxu1 %v2439_v0 }
 0xcfc   : > { %2024 = vmatpush3.bf16.msra.mxu1 %v2573_v33 }
 0xcfd   : > { %2025 = vmatprep.subr.bf16.mxu1 %v2439_v0 }
 0xd00   : > { %2026 = vmatpush3.bf16.msra.mxu1 %v2578_v34 }
 0xd01   : > { %2027 = vmatprep.subr.bf16.mxu1 %v2439_v0 }
 0xd04   : > { %2028 = vmatpush3.bf16.msra.mxu1 %v2582_v35 }
 0xd05   : > { %2029 = vmatprep.subr.bf16.mxu1 %v2439_v0 }
 0xd08   : > { %2030 = vmatpush3.bf16.msra.mxu1 %v2587_v36 }
 0xd09   : > { %2031 = vmatprep.subr.bf16.mxu1 %v2439_v0 }
 0xd0c   : > { %2032 = vmatpush3.bf16.msra.mxu1 %v2592_v37 }
 0xd0d   : > { %2065 = vmatprep.subr.bf16.mxu1 %v2439_v0 }
 0xdc2   : > { %v863_v43 = vpop.f32.mrb[16].mxu1 }
 0xdc3   : > { %v869_v44 = vsel %vm307_vm2, %v863_v43, -inf  ;;  %v2015_v45 = vpop.f32.mrb[17].mxu1 }
 0xdc4   : > { %v870_v46 = vrot.slane %v869_v44, 4  ;;  %v866_v47 = vpop.f32.mrb[18].mxu1 }
 0xdc5   : > { %v2016_v48 = vpop.f32.mrb[19].mxu1 }
 0xdc6   : > { %v871_v49 = vmax.f32 %v869_v44, %v870_v46 }
 0xdc8   : > { %v872_v50 = vrot.slane %v871_v49, 2 }
 0xdca   : > { %v873_v51 = vmax.f32 %v871_v49, %v872_v50 }
 0xdcc   : > { %v874_v52 = vrot.slane %v873_v51, 1 }
 0xdce   : > { %v875_v53 = vmax.f32 %v873_v51, %v874_v52 }
 0xdd0   : > { %v876_v54 = vsub.f32 %v863_v43, %v875_v53 }
 0xdd2   : > { %v877_v55 = vmul.f32 1.442695, %v876_v54 }
 0xdd4   : > { %2273 = vpow2.f32 %v877_v55 }
 0xdde   : > { %v2274_v56 = vpop.eup %2273 }
 0xddf   : > { %v879_v57 = vsel %vm307_vm2, %v2274_v56, 0.0 }
 0xde0   : > { %v880_v58 = vrot.slane %v879_v57, 4 }
 0xde2   : > { %v881_v59 = vadd.f32 %v880_v58, %v879_v57 }
 0xde4   : > { %v882_v60 = vrot.slane %v881_v59, 2 }
 0xde6   : > { %v883_v61 = vadd.f32 %v882_v60, %v881_v59 }
 0xde8   : > { %v884_v62 = vrot.slane %v883_v61, 1 }
 0xdea   : > { %v885_v63 = vadd.f32 %v884_v62, %v883_v61 }
 0xdec   : > { %2275 = vrcp.f32 %v885_v63 }
 0xdf6   : > { %v2276_v1 = vpop.eup %2275 }
 0xdf7   : > { %v887_v4 = vmul.f32 %v2276_v1, %v2274_v56 }
 0xdf9   : > { %v888_v5 = vsel %vm307_vm2, %v887_v4, 0.0 }
 0xdfa   : > { %889 = vadd.xlane.f32.xlu0 %v888_v5 }
 0xe87   : > { %v890_v9 = vpop.xlane.xlu0 %889 }
 0xe88   : > { %v1758_v10 = vadd.f32 -16.0, %v890_v9 }
 0xe8a   : > { %v892_v11 = vadd.f32 1e-06, %v1758_v10 }
 0xe8c   : > { %2277 = vrcp.f32 %v892_v11 }
 0xe96   : > { %v2278_v12 = vpop.eup %2277 }
 0xe97   : > { %v895_v13 = vmul.f32 %v2278_v12, %v887_v4 }
 0xe99   : > { %v896_v14 = vpack.c.bf16 %v895_v13, %v895_v13 }
 0xe9b   : > { %2034 = vmatmul.mubr.bf16.vlgmr.msra.gmra.mrb[20].mxu1 %v896_v14 }
 0xe9c   : > { %2066 = vmatpush3.bf16.msra.mxu1 %v2533_v2  ;;  %2069 = vmatprep.mubr.msk.bf16.mxu1 %vm2440_vm0, %v2439_v0 }
 0xe9d   : > { %2067 = vmatprep.subr.bf16.mxu1 %v2439_v0 }
 0xea0   : > { %2068 = vmatpush3.bf16.msra.mxu1 %v2541_v3 }
 0xea1   : > { %2073 = vmatprep.subr.bf16.mxu1 %v2439_v0 }
 0xf6e   : > { %v931_v15 = vpop.f32.mrb[20].mxu1 }
 0xf6f   : > { %v937_v16 = vmul.f32 %v931_v15, %v931_v15  ;;  %v2035_v17 = vpop.f32.mrb[21].mxu1 }
 0xf70   : > { %v934_v18 = vpop.f32.mrb[22].mxu1 }
 0xf71   : > { %v2036_v19 = vpop.f32.mrb[23].mxu1  ;;  %v938_v20 = vsel %vm425_vm3, %v937_v16, 0.0 }
 0xf72   : > { %939 = vadd.xlane.f32.xlu1 %v938_v20 }
 0xfff   : > { %v940_v21 = vpop.xlane.xlu1 %939 }
0x1000   : > { %2279 = vrsqrt.f32 %v940_v21  ;;  %vm943_vm12 = vcmp.eq.f32.partialorder %v940_v21, inf  ;;  %v946_v24 = vand.u32 2147483648, %v940_v21  ;;  %vm945_vm13 = vcmp.eq.f32.partialorder %v940_v21, 0.0 }
0x100a   : > { %v2280_v22 = vpop.eup %2279 }
0x100b   : > { %v942_v23 = vmul.f32 %v2280_v22, %v940_v21 }
0x100d   : > { %v944_v25 = vsel %vm943_vm12, %v940_v21, %v942_v23 }
0x100e   : > { %v947_v26 = vsel %vm945_vm13, %v946_v24, %v944_v25 }
0x100f   : > { %v948_v27 = vadd.f32 1e-06, %v947_v26 }
0x1011   : > { %2281 = vrcp.f32 %v948_v27 }
0x101b   : > { %v2282_v28 = vpop.eup %2281 }
0x101c   : > { %v951_v29 = vmul.f32 %v2282_v28, %v931_v15 }
0x101e   : > { %v952_v30 = vmul.f32 20.0, %v951_v29 }
0x1020   : > { %v953_v31 = vpack.c.bf16 %v952_v30, %v952_v30 }
0x1022   : > { %2042 = vmatmul.mubr.msk.bf16.vlgmr.msra.gmra.mrb[16].mxu0 %vm263_vm1, %v953_v31 }
0x1023   : > { %2046 = vmatpush3.bf16.msra.mxu0 %v2555_v6  ;;  %2061 = vmatprep.mubr.msk.bf16.mxu0 %vm2440_vm0, %v2439_v0 }
0x1024   : > { %2047 = vmatprep.subr.bf16.mxu0 %v2439_v0 }
0x1027   : > { %2048 = vmatpush3.bf16.msra.mxu0 %v2559_v7 }
0x1028   : > { %2049 = vmatprep.subr.bf16.mxu0 %v2439_v0 }
0x102b   : > { %2050 = vmatpush3.bf16.msra.mxu0 %v2564_v8 }
0x102c   : > { %2051 = vmatprep.subr.bf16.mxu0 %v2439_v0 }
0x102f   : > { %2052 = vmatpush3.bf16.msra.mxu0 %v2573_v33 }
0x1030   : > { %2053 = vmatprep.subr.bf16.mxu0 %v2439_v0 }
0x1033   : > { %2054 = vmatpush3.bf16.msra.mxu0 %v2578_v34 }
0x1034   : > { %2055 = vmatprep.subr.bf16.mxu0 %v2439_v0 }
0x1037   : > { %2056 = vmatpush3.bf16.msra.mxu0 %v2582_v35 }
0x1038   : > { %2057 = vmatprep.subr.bf16.mxu0 %v2439_v0 }
0x103b   : > { %2058 = vmatpush3.bf16.msra.mxu0 %v2587_v36 }
0x103c   : > { %2059 = vmatprep.subr.bf16.mxu0 %v2439_v0 }
0x103f   : > { %2060 = vmatpush3.bf16.msra.mxu0 %v2592_v37 }
0x1040   : > { %2093 = vmatprep.subr.bf16.mxu0 %v2439_v0 }
0x10f5   : > { %v991_v32 = vpop.f32.mrb[16].mxu0 }
0x10f6   : > { %v997_v38 = vsel %vm307_vm2, %v991_v32, -inf  ;;  %v2043_v39 = vpop.f32.mrb[17].mxu0 }
0x10f7   : > { %v998_v40 = vrot.slane %v997_v38, 4  ;;  %v994_v41 = vpop.f32.mrb[18].mxu0 }
0x10f8   : > { %v2044_v42 = vpop.f32.mrb[19].mxu0 }
0x10f9   : > { %v999_v43 = vmax.f32 %v997_v38, %v998_v40 }
0x10fb   : > { %v1000_v44 = vrot.slane %v999_v43, 2 }
0x10fd   : > { %v1001_v45 = vmax.f32 %v999_v43, %v1000_v44 }
0x10ff   : > { %v1002_v46 = vrot.slane %v1001_v45, 1 }
0x1101   : > { %v1003_v47 = vmax.f32 %v1001_v45, %v1002_v46 }
0x1103   : > { %v1004_v48 = vsub.f32 %v991_v32, %v1003_v47 }
0x1105   : > { %v1005_v49 = vmul.f32 1.442695, %v1004_v48 }
0x1107   : > { %2283 = vpow2.f32 %v1005_v49 }
0x1111   : > { %v2284_v50 = vpop.eup %2283 }
0x1112   : > { %v1007_v51 = vsel %vm307_vm2, %v2284_v50, 0.0 }
0x1113   : > { %v1008_v52 = vrot.slane %v1007_v51, 4 }
0x1115   : > { %v1009_v53 = vadd.f32 %v1008_v52, %v1007_v51  ;;  %v2772_v51 = vld [vmem:[%s2530_s8] sm:$0xff]   ;;  %v2779_v52 = vld [vmem:[%s2530_s8 + $0x8] sm:$0xff]  }
0x1117   : > { %v1010_v54 = vrot.slane %v1009_v53, 2 }
0x1119   : > { %v1011_v55 = vadd.f32 %v1010_v54, %v1009_v53 }
0x111b   : > { %v1012_v56 = vrot.slane %v1011_v55, 1 }
0x111d   : > { %v1013_v57 = vadd.f32 %v1012_v56, %v1011_v55 }
0x111f   : > { %2285 = vrcp.f32 %v1013_v57 }
0x1129   : > { %v2286_v58 = vpop.eup %2285 }
0x112a   : > { %v1015_v59 = vmul.f32 %v2286_v58, %v2284_v50 }
0x112c   : > { %v1016_v60 = vsel %vm307_vm2, %v1015_v59, 0.0 }
0x112d   : > { %1017 = vadd.xlane.f32.xlu0 %v1016_v60 }
0x11ba   : > { %v1018_v61 = vpop.xlane.xlu0 %1017 }
0x11bb   : > { %v1760_v62 = vadd.f32 -16.0, %v1018_v61 }
0x11bd   : > { %v1020_v63 = vadd.f32 1e-06, %v1760_v62 }
0x11bf   : > { %2287 = vrcp.f32 %v1020_v63 }
0x11c9   : > { %v2288_v1 = vpop.eup %2287 }
0x11ca   : > { %v1023_v4 = vmul.f32 %v2288_v1, %v1015_v59 }
0x11cc   : > { %v1024_v5 = vpack.c.bf16 %v1023_v4, %v1023_v4 }
0x11ce   : > { %2062 = vmatmul.mubr.bf16.vlgmr.msra.gmra.mrb[20].mxu0 %v1024_v5 }
0x11cf   : > { %2094 = vmatpush3.bf16.msra.mxu0 %v2533_v2  ;;  %2097 = vmatprep.mubr.msk.bf16.mxu0 %vm2440_vm0, %v2439_v0 }
0x11d0   : > { %2095 = vmatprep.subr.bf16.mxu0 %v2439_v0 }
0x11d3   : > { %2096 = vmatpush3.bf16.msra.mxu0 %v2541_v3 }
0x11d4   : > { %2101 = vmatprep.subr.bf16.mxu0 %v2439_v0 }
0x12a1   : > { %v1059_v9 = vpop.f32.mrb[20].mxu0 }
0x12a2   : > { %v1065_v10 = vmul.f32 %v1059_v9, %v1059_v9  ;;  %v2063_v11 = vpop.f32.mrb[21].mxu0 }
0x12a3   : > { %v1062_v12 = vpop.f32.mrb[22].mxu0 }
0x12a4   : > { %v2064_v13 = vpop.f32.mrb[23].mxu0  ;;  %v1066_v14 = vsel %vm425_vm3, %v1065_v10, 0.0  ;;  %v2786_v12 = vld [vmem:[%s2538_s11] sm:$0xff]  }
0x12a5   : > { %1067 = vadd.xlane.f32.xlu1 %v1066_v14  ;;  %v2793_v13 = vld [vmem:[%s2538_s11 + $0x8] sm:$0xff]   ;;  %v2798_v14 = vld [vmem:[%s2538_s11 + $0x10] sm:$0xff]  }
0x1332   : > { %v1068_v15 = vpop.xlane.xlu1 %1067 }
0x1333   : > { %2289 = vrsqrt.f32 %v1068_v15  ;;  %vm1071_vm14 = vcmp.eq.f32.partialorder %v1068_v15, inf  ;;  %v1074_v17 = vand.u32 2147483648, %v1068_v15  ;;  %vm1073_vm15 = vcmp.eq.f32.partialorder %v1068_v15, 0.0 }
0x133d   : > { %v2290_v2 = vpop.eup %2289 }
0x133e   : > { %v1070_v16 = vmul.f32 %v2290_v2, %v1068_v15  ;;  %v2808_v2 = vld [vmem:[%s2538_s11 + $0x20] sm:$0xff]  }
0x1340   : > { %v1072_v18 = vsel %vm1071_vm14, %v1068_v15, %v1070_v16  ;;  %v2803_v15 = vld [vmem:[%s2538_s11 + $0x18] sm:$0xff]   ;;  %v2813_v16 = vld [vmem:[%s2538_s11 + $0x28] sm:$0xff]  }
0x1341   : > { %v1075_v19 = vsel %vm1073_vm15, %v1074_v17, %v1072_v18  ;;  %v2818_v17 = vld [vmem:[%s2538_s11 + $0x30] sm:$0xff]   ;;  %v2823_v18 = vld [vmem:[%s2538_s11 + $0x38] sm:$0xff]  }
0x1342   : > { %v1076_v3 = vadd.f32 1e-06, %v1075_v19 }
0x1344   : > { %2291 = vrcp.f32 %v1076_v3 }
0x134e   : > { %v2292_v20 = vpop.eup %2291 }
0x134f   : > { %v1079_v21 = vmul.f32 %v2292_v20, %v1059_v9 }
0x1351   : > { %v1080_v22 = vmul.f32 20.0, %v1079_v21 }
0x1353   : > { %v1081_v23 = vpack.c.bf16 %v1080_v22, %v1080_v22 }
0x1355   : > { %2070 = vmatmul.mubr.msk.bf16.vlgmr.msra.gmra.mrb[24].mxu1 %vm263_vm1, %v1081_v23 }
0x1356   : > { %2074 = vmatpush3.bf16.msra.mxu1 %v2555_v6  ;;  %2089 = vmatprep.mubr.msk.bf16.mxu1 %vm2440_vm0, %v2439_v0 }
0x1357   : > { %2075 = vmatprep.subr.bf16.mxu1 %v2439_v0 }
0x135a   : > { %2076 = vmatpush3.bf16.msra.mxu1 %v2559_v7 }
0x135b   : > { %2077 = vmatprep.subr.bf16.mxu1 %v2439_v0 }
0x135e   : > { %2078 = vmatpush3.bf16.msra.mxu1 %v2564_v8 }
0x135f   : > { %2079 = vmatprep.subr.bf16.mxu1 %v2439_v0 }
0x1362   : > { %2080 = vmatpush3.bf16.msra.mxu1 %v2573_v33 }
0x1363   : > { %2081 = vmatprep.subr.bf16.mxu1 %v2439_v0 }
0x1366   : > { %2082 = vmatpush3.bf16.msra.mxu1 %v2578_v34 }
0x1367   : > { %2083 = vmatprep.subr.bf16.mxu1 %v2439_v0 }
0x136a   : > { %2084 = vmatpush3.bf16.msra.mxu1 %v2582_v35 }
0x136b   : > { %2085 = vmatprep.subr.bf16.mxu1 %v2439_v0 }
0x136e   : > { %2086 = vmatpush3.bf16.msra.mxu1 %v2587_v36 }
0x136f   : > { %2087 = vmatprep.subr.bf16.mxu1 %v2439_v0 }
0x1372   : > { %2088 = vmatpush3.bf16.msra.mxu1 %v2592_v37 }
0x1373   : > { %2121 = vmatprep.subr.bf16.mxu1 %v2439_v0 }
0x1428   : > { %v1119_v6 = vpop.f32.mrb[24].mxu1 }
0x1429   : > { %v1125_v7 = vsel %vm307_vm2, %v1119_v6, -inf  ;;  %v2071_v8 = vpop.f32.mrb[25].mxu1 }
0x142a   : > { %v1126_v33 = vrot.slane %v1125_v7, 4  ;;  %v1122_v34 = vpop.f32.mrb[26].mxu1 }
0x142b   : > { %v2072_v24 = vpop.f32.mrb[27].mxu1 }
0x142c   : > { %v1127_v25 = vmax.f32 %v1125_v7, %v1126_v33 }
0x142e   : > { %v1128_v26 = vrot.slane %v1127_v25, 2 }
0x1430   : > { %v1129_v35 = vmax.f32 %v1127_v25, %v1128_v26 }
0x1432   : > { %v1130_v27 = vrot.slane %v1129_v35, 1 }
0x1434   : > { %v1131_v28 = vmax.f32 %v1129_v35, %v1130_v27 }
0x1436   : > { %v1132_v29 = vsub.f32 %v1119_v6, %v1131_v28 }
0x1438   : > { %v1133_v36 = vmul.f32 1.442695, %v1132_v29 }
0x143a   : > { %2293 = vpow2.f32 %v1133_v36 }
0x1444   : > { %v2294_v30 = vpop.eup %2293 }
0x1445   : > { %v1135_v37 = vsel %vm307_vm2, %v2294_v30, 0.0 }
0x1446   : > { %v1136_v31 = vrot.slane %v1135_v37, 4 }
0x1448   : > { %v1137_v32 = vadd.f32 %v1136_v31, %v1135_v37 }
0x144a   : > { %v1138_v38 = vrot.slane %v1137_v32, 2 }
0x144c   : > { %v1139_v39 = vadd.f32 %v1138_v38, %v1137_v32 }
0x144e   : > { %v1140_v40 = vrot.slane %v1139_v39, 1 }
0x1450   : > { %v1141_v41 = vadd.f32 %v1140_v40, %v1139_v39 }
0x1452   : > { %2295 = vrcp.f32 %v1141_v41 }
0x145c   : > { %v2296_v42 = vpop.eup %2295 }
0x145d   : > { %v1143_v43 = vmul.f32 %v2296_v42, %v2294_v30 }
0x145f   : > { %v1144_v44 = vsel %vm307_vm2, %v1143_v43, 0.0 }
0x1460   : > { %1145 = vadd.xlane.f32.xlu0 %v1144_v44 }
0x14ed   : > { %v1146_v45 = vpop.xlane.xlu0 %1145 }
0x14ee   : > { %v1762_v46 = vadd.f32 -16.0, %v1146_v45 }
0x14f0   : > { %v1148_v47 = vadd.f32 1e-06, %v1762_v46 }
0x14f2   : > { %2297 = vrcp.f32 %v1148_v47 }
0x14fc   : > { %v2298_v48 = vpop.eup %2297 }
0x14fd   : > { %v1151_v49 = vmul.f32 %v2298_v48, %v1143_v43 }
0x14ff   : > { %v1152_v50 = vpack.c.bf16 %v1151_v49, %v1151_v49 }
0x1501   : > { %2090 = vmatmul.mubr.bf16.vlgmr.msra.gmra.mrb[28].mxu1 %v1152_v50 }
0x1502   : > { %2122 = vmatpush3.bf16.msra.mxu1 %v2772_v51  ;;  %2125 = vmatprep.mubr.msk.bf16.mxu1 %vm2440_vm0, %v2439_v0 }
0x1503   : > { %2123 = vmatprep.subr.bf16.mxu1 %v2439_v0 }
0x1506   : > { %2124 = vmatpush3.bf16.msra.mxu1 %v2779_v52 }
0x1507   : > { %2129 = vmatprep.subr.bf16.mxu1 %v2439_v0 }
0x15d4   : > { %v1187_v53 = vpop.f32.mrb[28].mxu1 }
0x15d5   : > { %v1193_v54 = vmul.f32 %v1187_v53, %v1187_v53  ;;  %v2091_v55 = vpop.f32.mrb[29].mxu1 }
0x15d6   : > { %v1190_v56 = vpop.f32.mrb[30].mxu1 }
0x15d7   : > { %v2092_v57 = vpop.f32.mrb[31].mxu1  ;;  %v1194_v58 = vsel %vm425_vm3, %v1193_v54, 0.0 }
0x15d8   : > { %1195 = vadd.xlane.f32.xlu1 %v1194_v58 }
0x1665   : > { %v1196_v59 = vpop.xlane.xlu1 %1195 }
0x1666   : > { %2299 = vrsqrt.f32 %v1196_v59  ;;  %vm1199_vm4 = vcmp.eq.f32.partialorder %v1196_v59, inf  ;;  %v1202_v62 = vand.u32 2147483648, %v1196_v59  ;;  %vm1201_vm5 = vcmp.eq.f32.partialorder %v1196_v59, 0.0 }
0x1670   : > { %v2300_v60 = vpop.eup %2299 }
0x1671   : > { %v1198_v61 = vmul.f32 %v2300_v60, %v1196_v59 }
0x1673   : > { %v1200_v63 = vsel %vm1199_vm4, %v1196_v59, %v1198_v61 }
0x1674   : > { %v1203_v1 = vsel %vm1201_vm5, %v1202_v62, %v1200_v63 }
0x1675   : > { %v1204_v4 = vadd.f32 1e-06, %v1203_v1 }
0x1677   : > { %2301 = vrcp.f32 %v1204_v4 }
0x1681   : > { %v2302_v5 = vpop.eup %2301 }
0x1682   : > { %v1207_v9 = vmul.f32 %v2302_v5, %v1187_v53 }
0x1684   : > { %v1208_v10 = vmul.f32 20.0, %v1207_v9 }
0x1686   : > { %v1209_v11 = vpack.c.bf16 %v1208_v10, %v1208_v10 }
0x1688   : > { %2098 = vmatmul.mubr.msk.bf16.vlgmr.msra.gmra.mrb[24].mxu0 %vm263_vm1, %v1209_v11 }
0x1689   : > { %2102 = vmatpush3.bf16.msra.mxu0 %v2786_v12  ;;  %2117 = vmatprep.mubr.msk.bf16.mxu0 %vm2440_vm0, %v2439_v0 }
0x168a   : > { %2103 = vmatprep.subr.bf16.mxu0 %v2439_v0 }
0x168d   : > { %2104 = vmatpush3.bf16.msra.mxu0 %v2793_v13 }
0x168e   : > { %2105 = vmatprep.subr.bf16.mxu0 %v2439_v0 }
0x1691   : > { %2106 = vmatpush3.bf16.msra.mxu0 %v2798_v14 }
0x1692   : > { %2107 = vmatprep.subr.bf16.mxu0 %v2439_v0 }
0x1695   : > { %2108 = vmatpush3.bf16.msra.mxu0 %v2803_v15 }
0x1696   : > { %2109 = vmatprep.subr.bf16.mxu0 %v2439_v0 }
0x1699   : > { %2110 = vmatpush3.bf16.msra.mxu0 %v2808_v2 }
0x169a   : > { %2111 = vmatprep.subr.bf16.mxu0 %v2439_v0 }
0x169d   : > { %2112 = vmatpush3.bf16.msra.mxu0 %v2813_v16 }
0x169e   : > { %2113 = vmatprep.subr.bf16.mxu0 %v2439_v0 }
0x16a1   : > { %2114 = vmatpush3.bf16.msra.mxu0 %v2818_v17 }
0x16a2   : > { %2115 = vmatprep.subr.bf16.mxu0 %v2439_v0 }
0x16a5   : > { %2116 = vmatpush3.bf16.msra.mxu0 %v2823_v18 }
0x16a6   : > { %2149 = vmatprep.subr.bf16.mxu0 %v2439_v0 }
0x175b   : > { %v1247_v19 = vpop.f32.mrb[24].mxu0 }
0x175c   : > { %v1253_v3 = vsel %vm307_vm2, %v1247_v19, -inf  ;;  %v2099_v20 = vpop.f32.mrb[25].mxu0 }
0x175d   : > { %v1254_v21 = vrot.slane %v1253_v3, 4  ;;  %v1250_v22 = vpop.f32.mrb[26].mxu0 }
0x175e   : > { %v2100_v23 = vpop.f32.mrb[27].mxu0 }
0x175f   : > { %v1255_v6 = vmax.f32 %v1253_v3, %v1254_v21 }
0x1761   : > { %v1256_v7 = vrot.slane %v1255_v6, 2 }
0x1763   : > { %v1257_v8 = vmax.f32 %v1255_v6, %v1256_v7 }
0x1765   : > { %v1258_v33 = vrot.slane %v1257_v8, 1 }
0x1767   : > { %v1259_v34 = vmax.f32 %v1257_v8, %v1258_v33 }
0x1769   : > { %v1260_v24 = vsub.f32 %v1247_v19, %v1259_v34 }
0x176b   : > { %v1261_v25 = vmul.f32 1.442695, %v1260_v24 }
0x176d   : > { %2303 = vpow2.f32 %v1261_v25 }
0x1777   : > { %v2304_v26 = vpop.eup %2303 }
0x1778   : > { %v1263_v35 = vsel %vm307_vm2, %v2304_v26, 0.0 }
0x1779   : > { %v1264_v27 = vrot.slane %v1263_v35, 4 }
0x177b   : > { %v1265_v28 = vadd.f32 %v1264_v27, %v1263_v35 }
0x177d   : > { %v1266_v29 = vrot.slane %v1265_v28, 2 }
0x177f   : > { %v1267_v36 = vadd.f32 %v1266_v29, %v1265_v28 }
0x1781   : > { %v1268_v30 = vrot.slane %v1267_v36, 1 }
0x1783   : > { %v1269_v37 = vadd.f32 %v1268_v30, %v1267_v36 }
0x1785   : > { %2305 = vrcp.f32 %v1269_v37 }
0x178f   : > { %v2306_v31 = vpop.eup %2305 }
0x1790   : > { %v1271_v32 = vmul.f32 %v2306_v31, %v2304_v26 }
0x1792   : > { %v1272_v38 = vsel %vm307_vm2, %v1271_v32, 0.0 }
0x1793   : > { %1273 = vadd.xlane.f32.xlu0 %v1272_v38 }
0x1820   : > { %v1274_v39 = vpop.xlane.xlu0 %1273 }
0x1821   : > { %v1764_v40 = vadd.f32 -16.0, %v1274_v39 }
0x1823   : > { %v1276_v41 = vadd.f32 1e-06, %v1764_v40 }
0x1825   : > { %2307 = vrcp.f32 %v1276_v41 }
0x182f   : > { %v2308_v42 = vpop.eup %2307 }
0x1830   : > { %v1279_v43 = vmul.f32 %v2308_v42, %v1271_v32 }
0x1832   : > { %v1280_v44 = vpack.c.bf16 %v1279_v43, %v1279_v43 }
0x1834   : > { %2118 = vmatmul.mubr.bf16.vlgmr.msra.gmra.mrb[28].mxu0 %v1280_v44 }
0x1835   : > { %2150 = vmatpush3.bf16.msra.mxu0 %v2772_v51  ;;  %2153 = vmatprep.mubr.msk.bf16.mxu0 %vm2440_vm0, %v2439_v0 }
0x1836   : > { %2151 = vmatprep.subr.bf16.mxu0 %v2439_v0 }
0x1839   : > { %2152 = vmatpush3.bf16.msra.mxu0 %v2779_v52 }
0x183a   : > { %2157 = vmatprep.subr.bf16.mxu0 %v2439_v0 }
0x1907   : > { %v1315_v45 = vpop.f32.mrb[28].mxu0 }
0x1908   : > { %v1321_v46 = vmul.f32 %v1315_v45, %v1315_v45  ;;  %v2119_v47 = vpop.f32.mrb[29].mxu0 }
0x1909   : > { %v1318_v48 = vpop.f32.mrb[30].mxu0 }
0x190a   : > { %v2120_v49 = vpop.f32.mrb[31].mxu0  ;;  %v1322_v50 = vsel %vm425_vm3, %v1321_v46, 0.0 }
0x190b   : > { %1323 = vadd.xlane.f32.xlu1 %v1322_v50 }
0x1998   : > { %v1324_v53 = vpop.xlane.xlu1 %1323 }
0x1999   : > { %2309 = vrsqrt.f32 %v1324_v53  ;;  %vm1327_vm6 = vcmp.eq.f32.partialorder %v1324_v53, inf  ;;  %v1330_v55 = vand.u32 2147483648, %v1324_v53  ;;  %vm1329_vm7 = vcmp.eq.f32.partialorder %v1324_v53, 0.0 }
0x19a3   : > { %v2310_v51 = vpop.eup %2309 }
0x19a4   : > { %v1326_v54 = vmul.f32 %v2310_v51, %v1324_v53 }
0x19a6   : > { %v1328_v56 = vsel %vm1327_vm6, %v1324_v53, %v1326_v54 }
0x19a7   : > { %v1331_v57 = vsel %vm1329_vm7, %v1330_v55, %v1328_v56 }
0x19a8   : > { %v1332_v52 = vadd.f32 1e-06, %v1331_v57 }
0x19aa   : > { %2311 = vrcp.f32 %v1332_v52 }
0x19b4   : > { %v2312_v58 = vpop.eup %2311 }
0x19b5   : > { %v1335_v59 = vmul.f32 %v2312_v58, %v1315_v45 }
0x19b7   : > { %v1336_v60 = vmul.f32 20.0, %v1335_v59 }
0x19b9   : > { %v1337_v61 = vpack.c.bf16 %v1336_v60, %v1336_v60 }
0x19bb   : > { %2126 = vmatmul.mubr.msk.bf16.vlgmr.msra.gmra.mrb[32].mxu1 %vm263_vm1, %v1337_v61 }
0x19bc   : > { %2130 = vmatpush3.bf16.msra.mxu1 %v2786_v12  ;;  %2145 = vmatprep.mubr.msk.bf16.mxu1 %vm2440_vm0, %v2439_v0 }
0x19bd   : > { %2131 = vmatprep.subr.bf16.mxu1 %v2439_v0 }
0x19c0   : > { %2132 = vmatpush3.bf16.msra.mxu1 %v2793_v13 }
0x19c1   : > { %2133 = vmatprep.subr.bf16.mxu1 %v2439_v0 }
0x19c4   : > { %2134 = vmatpush3.bf16.msra.mxu1 %v2798_v14 }
0x19c5   : > { %2135 = vmatprep.subr.bf16.mxu1 %v2439_v0 }
0x19c8   : > { %2136 = vmatpush3.bf16.msra.mxu1 %v2803_v15 }
0x19c9   : > { %2137 = vmatprep.subr.bf16.mxu1 %v2439_v0 }
0x19cc   : > { %2138 = vmatpush3.bf16.msra.mxu1 %v2808_v2 }
0x19cd   : > { %2139 = vmatprep.subr.bf16.mxu1 %v2439_v0 }
0x19d0   : > { %2140 = vmatpush3.bf16.msra.mxu1 %v2813_v16 }
0x19d1   : > { %2141 = vmatprep.subr.bf16.mxu1 %v2439_v0 }
0x19d4   : > { %2142 = vmatpush3.bf16.msra.mxu1 %v2818_v17 }
0x19d5   : > { %2143 = vmatprep.subr.bf16.mxu1 %v2439_v0 }
0x19d8   : > { %2144 = vmatpush3.bf16.msra.mxu1 %v2823_v18 }
0x1a8e   : > { %v1375_v62 = vpop.f32.mrb[32].mxu1 }
0x1a8f   : > { %v1381_v63 = vsel %vm307_vm2, %v1375_v62, -inf  ;;  %v2127_v1 = vpop.f32.mrb[33].mxu1 }
0x1a90   : > { %v1382_v4 = vrot.slane %v1381_v63, 4  ;;  %v1378_v5 = vpop.f32.mrb[34].mxu1 }
0x1a91   : > { %v2128_v9 = vpop.f32.mrb[35].mxu1 }
0x1a92   : > { %v1383_v10 = vmax.f32 %v1381_v63, %v1382_v4 }
0x1a94   : > { %v1384_v11 = vrot.slane %v1383_v10, 2 }
0x1a96   : > { %v1385_v19 = vmax.f32 %v1383_v10, %v1384_v11 }
0x1a98   : > { %v1386_v3 = vrot.slane %v1385_v19, 1 }
0x1a9a   : > { %v1387_v20 = vmax.f32 %v1385_v19, %v1386_v3 }
0x1a9c   : > { %v1388_v21 = vsub.f32 %v1375_v62, %v1387_v20 }
0x1a9e   : > { %v1389_v22 = vmul.f32 1.442695, %v1388_v21 }
0x1aa0   : > { %2313 = vpow2.f32 %v1389_v22 }
0x1aaa   : > { %v2314_v23 = vpop.eup %2313 }
0x1aab   : > { %v1391_v6 = vsel %vm307_vm2, %v2314_v23, 0.0 }
0x1aac   : > { %v1392_v7 = vrot.slane %v1391_v6, 4 }
0x1aae   : > { %v1393_v8 = vadd.f32 %v1392_v7, %v1391_v6 }
0x1ab0   : > { %v1394_v33 = vrot.slane %v1393_v8, 2 }
0x1ab2   : > { %v1395_v34 = vadd.f32 %v1394_v33, %v1393_v8 }
0x1ab4   : > { %v1396_v24 = vrot.slane %v1395_v34, 1 }
0x1ab6   : > { %v1397_v25 = vadd.f32 %v1396_v24, %v1395_v34 }
0x1ab8   : > { %2315 = vrcp.f32 %v1397_v25 }
0x1ac2   : > { %v2316_v26 = vpop.eup %2315 }
0x1ac3   : > { %v1399_v35 = vmul.f32 %v2316_v26, %v2314_v23 }
0x1ac5   : > { %v1400_v27 = vsel %vm307_vm2, %v1399_v35, 0.0 }
0x1ac6   : > { %1401 = vadd.xlane.f32.xlu0 %v1400_v27 }
0x1b53   : > { %v1402_v28 = vpop.xlane.xlu0 %1401 }
0x1b54   : > { %v1766_v29 = vadd.f32 -16.0, %v1402_v28 }
0x1b56   : > { %v1404_v36 = vadd.f32 1e-06, %v1766_v29 }
0x1b58   : > { %2317 = vrcp.f32 %v1404_v36 }
0x1b62   : > { %v2318_v30 = vpop.eup %2317 }
0x1b63   : > { %v1407_v37 = vmul.f32 %v2318_v30, %v1399_v35 }
0x1b65   : > { %v1408_v31 = vpack.c.bf16 %v1407_v37, %v1407_v37 }
0x1b67   : > { %2146 = vmatmul.mubr.bf16.vlgmr.msra.gmra.mrb[36].mxu1 %v1408_v31 }
0x1c3a   : > { %v1443_v32 = vpop.f32.mrb[36].mxu1 }
0x1c3b   : > { %v1449_v38 = vmul.f32 %v1443_v32, %v1443_v32  ;;  %v2147_v39 = vpop.f32.mrb[37].mxu1 }
0x1c3c   : > { %v1446_v40 = vpop.f32.mrb[38].mxu1 }
0x1c3d   : > { %v2148_v41 = vpop.f32.mrb[39].mxu1  ;;  %v1450_v42 = vsel %vm425_vm3, %v1449_v38, 0.0 }
0x1c3e   : > { %1451 = vadd.xlane.f32.xlu1 %v1450_v42 }
0x1ccb   : > { %v1452_v43 = vpop.xlane.xlu1 %1451 }
0x1ccc   : > { %2319 = vrsqrt.f32 %v1452_v43  ;;  %vm1455_vm8 = vcmp.eq.f32.partialorder %v1452_v43, inf  ;;  %v1458_v46 = vand.u32 2147483648, %v1452_v43  ;;  %vm1457_vm9 = vcmp.eq.f32.partialorder %v1452_v43, 0.0 }
0x1cd6   : > { %v2320_v44 = vpop.eup %2319 }
0x1cd7   : > { %v1454_v45 = vmul.f32 %v2320_v44, %v1452_v43 }
0x1cd9   : > { %v1456_v47 = vsel %vm1455_vm8, %v1452_v43, %v1454_v45 }
0x1cda   : > { %v1459_v48 = vsel %vm1457_vm9, %v1458_v46, %v1456_v47 }
0x1cdb   : > { %v1460_v49 = vadd.f32 1e-06, %v1459_v48 }
0x1cdd   : > { %2321 = vrcp.f32 %v1460_v49 }
0x1ce7   : > { %v2322_v50 = vpop.eup %2321 }
0x1ce8   : > { %v1463_v53 = vmul.f32 %v2322_v50, %v1443_v32 }
0x1cea   : > { %v1464_v51 = vmul.f32 20.0, %v1463_v53 }
0x1cec   : > { %v1465_v54 = vpack.c.bf16 %v1464_v51, %v1464_v51 }
0x1cee   : > { %2154 = vmatmul.mubr.msk.bf16.vlgmr.msra.gmra.mrb[32].mxu0 %vm263_vm1, %v1465_v54 }
0x1cef   : > { %2158 = vmatpush3.bf16.msra.mxu0 %v2786_v12  ;;  %2173 = vmatprep.mubr.msk.bf16.mxu0 %vm2440_vm0, %v2439_v0 }
0x1cf0   : > { %2159 = vmatprep.subr.bf16.mxu0 %v2439_v0 }
0x1cf3   : > { %2160 = vmatpush3.bf16.msra.mxu0 %v2793_v13 }
0x1cf4   : > { %2161 = vmatprep.subr.bf16.mxu0 %v2439_v0 }
0x1cf7   : > { %2162 = vmatpush3.bf16.msra.mxu0 %v2798_v14 }
0x1cf8   : > { %2163 = vmatprep.subr.bf16.mxu0 %v2439_v0 }
0x1cfb   : > { %2164 = vmatpush3.bf16.msra.mxu0 %v2803_v15 }
0x1cfc   : > { %2165 = vmatprep.subr.bf16.mxu0 %v2439_v0 }
0x1cff   : > { %2166 = vmatpush3.bf16.msra.mxu0 %v2808_v2 }
0x1d00   : > { %2167 = vmatprep.subr.bf16.mxu0 %v2439_v0 }
0x1d03   : > { %2168 = vmatpush3.bf16.msra.mxu0 %v2813_v16 }
0x1d04   : > { %2169 = vmatprep.subr.bf16.mxu0 %v2439_v0 }
0x1d07   : > { %2170 = vmatpush3.bf16.msra.mxu0 %v2818_v17 }
0x1d08   : > { %2171 = vmatprep.subr.bf16.mxu0 %v2439_v0 }
0x1d0b   : > { %2172 = vmatpush3.bf16.msra.mxu0 %v2823_v18 }
0x1dc1   : > { %v1503_v12 = vpop.f32.mrb[32].mxu0 }
0x1dc2   : > { %v1509_v13 = vsel %vm307_vm2, %v1503_v12, -inf  ;;  %v2155_v14 = vpop.f32.mrb[33].mxu0 }
0x1dc3   : > { %v1510_v15 = vrot.slane %v1509_v13, 4  ;;  %v1506_v55 = vpop.f32.mrb[34].mxu0 }
0x1dc4   : > { %v2156_v56 = vpop.f32.mrb[35].mxu0 }
0x1dc5   : > { %v1511_v2 = vmax.f32 %v1509_v13, %v1510_v15 }
0x1dc7   : > { %v1512_v57 = vrot.slane %v1511_v2, 2 }
0x1dc9   : > { %v1513_v52 = vmax.f32 %v1511_v2, %v1512_v57 }
0x1dcb   : > { %v1514_v58 = vrot.slane %v1513_v52, 1 }
0x1dcd   : > { %v1515_v16 = vmax.f32 %v1513_v52, %v1514_v58 }
0x1dcf   : > { %v1516_v59 = vsub.f32 %v1503_v12, %v1515_v16 }
0x1dd1   : > { %v1517_v60 = vmul.f32 1.442695, %v1516_v59 }
0x1dd3   : > { %2323 = vpow2.f32 %v1517_v60 }
0x1ddd   : > { %v2324_v17 = vpop.eup %2323 }
0x1dde   : > { %v1519_v0 = vsel %vm307_vm2, %v2324_v17, 0.0 }
0x1ddf   : > { %v1520_v18 = vrot.slane %v1519_v0, 4 }
0x1de1   : > { %v1521_v61 = vadd.f32 %v1520_v18, %v1519_v0 }
0x1de3   : > { %v1522_v62 = vrot.slane %v1521_v61, 2 }
0x1de5   : > { %v1523_v63 = vadd.f32 %v1522_v62, %v1521_v61 }
0x1de7   : > { %v1524_v1 = vrot.slane %v1523_v63, 1 }
0x1de9   : > { %v1525_v4 = vadd.f32 %v1524_v1, %v1523_v63 }
0x1deb   : > { %2325 = vrcp.f32 %v1525_v4 }
0x1df5   : > { %v2326_v5 = vpop.eup %2325 }
0x1df6   : > { %v1527_v9 = vmul.f32 %v2326_v5, %v2324_v17 }
0x1df8   : > { %v1528_v10 = vsel %vm307_vm2, %v1527_v9, 0.0 }
0x1df9   : > { %1529 = vadd.xlane.f32.xlu0 %v1528_v10 }
0x1e86   : > { %v1530_v11 = vpop.xlane.xlu0 %1529 }
0x1e87   : > { %v1768_v19 = vadd.f32 -16.0, %v1530_v11 }
0x1e89   : > { %v1532_v3 = vadd.f32 1e-06, %v1768_v19 }
0x1e8b   : > { %2327 = vrcp.f32 %v1532_v3 }
0x1e95   : > { %v2328_v20 = vpop.eup %2327 }
0x1e96   : > { %v1535_v21 = vmul.f32 %v2328_v20, %v1527_v9 }
0x1e98   : > { %v1536_v22 = vpack.c.bf16 %v1535_v21, %v1535_v21  ;;  %1593 = vst [vmem:[%s216_s14] sm:$0xf] %v1535_v21 }
0x1e9a   : > { %2174 = vmatmul.mubr.bf16.vlgmr.msra.gmra.mrb[36].mxu0 %v1536_v22 }
0x1f6d   : > { %v1571_v23 = vpop.f32.mrb[36].mxu0 }
0x1f6e   : > { %v1577_v6 = vmul.f32 %v1571_v23, %v1571_v23  ;;  %v2175_v7 = vpop.f32.mrb[37].mxu0 }
0x1f6f   : > { %v1574_v8 = vpop.f32.mrb[38].mxu0 }
0x1f70   : > { %v2176_v33 = vpop.f32.mrb[39].mxu0  ;;  %v1578_v34 = vsel %vm425_vm3, %v1577_v6, 0.0 }
0x1f71   : > { %1579 = vadd.xlane.f32.xlu1 %v1578_v34 }
0x1f72   : > { %2356 = shalt.err (!%p2353_p3)
}
0x1f73   : > { %s2357_s8 = scalar_lea.hbm %s2893_s27, 64  ;;  %s2361_s11 = scalar_lea.hbm %s2968_s4, 128 }
0x1f74   : > { %p2358_p4 = scmp.ne.s32.totalorder %s2893_s27, %s2357_s8  ;;  %p2362_p9 = scmp.lt.u32.totalorder %s2893_s27, %s2968_s4 }
0x1f75   : > { %p2363_p10 = scmp.lt.u32.totalorder %s2361_s11, %s2357_s8  ;;  %p2365_p12 = scmp.lt.u32.totalorder %s2357_s8, %s2893_s27 }
0x1f76   : > { %p2359_p7 = pnand %p2358_p4, %p2506_p5 }
0x1f77   : > { %p2364_p11 = por %p2363_p10, %p2362_p9 }
0x1f78   : > { %p2360_p8 = pneg %p2359_p7 }
0x1f79   : > { %p2366_p13 = por %p2365_p12, %p2364_p11 }
0x1f7b   : > { %p2367_p0 = pnand %p2366_p13, %p2360_p8 }
0x1f7d   : > { %2370 = shalt.err (!%p2367_p0)
}
0x1f7e   : > { %2178 = dma.vmem_to_hbm [thread:$0]  (%p2506_p5), %s1627_s28, 64, %s2893_s27, %s1600_s29  }
0x1f7f   : > { %s209_s23 = scalar_lea.vmem [#allocation2], %s1733_s13  ;;  %s2920_s29 = scalar_lea.hbm %s2967_s3, %s1771_s20 }
0x1f80   : > { %s1613_s30 = sshll.u32 %s209_s23, 4  ;;  %s1595_s5 = scalar_lea.sflag [#allocation3], %s2881_s12  ;;  %s2922_s30 = int_to_ptr.vmem [resolvable:$true] %s1613_s30 }
0x1f81   : > { %s2371_s6 = scalar_lea.vmem %s2922_s30, 64  ;;  %s2442_s13 = smov [#allocation2]  }
0x1f82   : > { %p2372_p1 = scmp.ne.s32.totalorder %s2922_s30, %s2371_s6  ;;  %s2375_s19 = sshll.u32 %s2442_s13, 4  ;;  %s2376_s19 = int_to_ptr.vmem [resolvable:$false] %s2375_s19 }
0x1f83   : > { %s2377_s7 = scalar_lea.vmem %s2376_s19, 128  ;;  %p2378_p4 = scmp.lt.s32.totalorder %s2922_s30, %s2376_s19 }
0x1f84   : > { %p2373_p2 = pnand %p2372_p1, %p2506_p5  ;;  %p2379_p7 = scmp.lt.s32.totalorder %s2377_s7, %s2371_s6 }
0x1f86   : > { %p2374_p3 = pneg %p2373_p2  ;;  %p2380_p8 = por %p2379_p7, %p2378_p4 }
0x1f88   : > { %p2381_p9 = pnand %p2380_p8, %p2374_p3 }
0x1ffe   : > { %v1580_v24 = vpop.xlane.xlu1 %1579 }
0x1fff   : > { %2329 = vrsqrt.f32 %v1580_v24  ;;  %vm1583_vm0 = vcmp.eq.f32.partialorder %v1580_v24, inf  ;;  %v1586_v35 = vand.u32 2147483648, %v1580_v24  ;;  %vm1585_vm1 = vcmp.eq.f32.partialorder %v1580_v24, 0.0 }
0x2009   : > { %v2330_v25 = vpop.eup %2329 }
0x200a   : > { %v1582_v26 = vmul.f32 %v2330_v25, %v1580_v24 }
0x200c   : > { %v1584_v27 = vsel %vm1583_vm0, %v1580_v24, %v1582_v26 }
0x200d   : > { %v1587_v28 = vsel %vm1585_vm1, %v1586_v35, %v1584_v27 }
0x200e   : > { %v1588_v29 = vadd.f32 1e-06, %v1587_v28 }
0x2010   : > { %2331 = vrcp.f32 %v1588_v29 }
0x201a   : > { %v2332_v36 = vpop.eup %2331 }
0x201b   : > { %v1591_v30 = vmul.f32 %v2332_v36, %v1571_v23 }
0x201d   : > { %1592 = vst.msk [vmem:[%s209_s23] sm:$0xf] %vm425_vm3, %v1591_v30 }
0x201e   : > { %2384 = shalt.err (!%p2381_p9)
}
0x201f   : > { %s2385_s12 = scalar_lea.hbm %s2920_s29, 64  ;;  %s2389_s9 = scalar_lea.hbm %s2967_s3, 128 }
0x2020   : > { %p2386_p10 = scmp.ne.s32.totalorder %s2920_s29, %s2385_s12  ;;  %p2390_p13 = scmp.lt.u32.totalorder %s2920_s29, %s2967_s3 }
0x2021   : > { %p2391_p0 = scmp.lt.u32.totalorder %s2389_s9, %s2385_s12  ;;  %p2393_p2 = scmp.lt.u32.totalorder %s2385_s12, %s2920_s29 }
0x2022   : > { %p2387_p11 = pnand %p2386_p10, %p2506_p5 }
0x2023   : > { %p2392_p1 = por %p2391_p0, %p2390_p13 }
0x2024   : > { %p2388_p12 = pneg %p2387_p11 }
0x2025   : > { %p2394_p3 = por %p2393_p2, %p2392_p1 }
0x2027   : > { %p2395_p4 = pnand %p2394_p3, %p2388_p12 }
0x2029   : > { %2398 = shalt.err (!%p2395_p4)
}
0x202a   : > { %2177 = dma.vmem_to_hbm [thread:$0]  (%p2506_p5), %s2922_s30, 64, %s2920_s29, %s1595_s5  }
0x202b PF: > { %p2188_p7 = scmp.ge.s32.totalorder %s2437_s18, 2  ;;  %s1638_s14 = sand.u32 1, %s2425_s15  }
0x202c   : > { %s1639_s22 = scalar_lea.sflag [#allocation3], %s1638_s14 }
0x202d   : > { %p2182_p8 = pnand %p2188_p7, %p2510_p6 }
0x202f   : > { %2416 = dma.done.wait (!%p2182_p8), %s1639_s22, 64  }
0x2030   : > { %2418 = vsyncadd (!%p2182_p8), %s1639_s22, 4294967232  ;;  %s1648_s23 = scalar_lea.sflag [#allocation5], %s1638_s14 }
0x2031   : > { %2420 = dma.done.wait (!%p2182_p8), %s1648_s23, 64  }
0x2032   : > { %2422 = vsyncadd (!%p2182_p8), %s1648_s23, 4294967232  ;;  %p18_p5 = scmp.ge.s32.totalorder %s2493_s21, 4   ;;  %s2971_s15 = smov %s2429_s16 }
0x2033   : > { %s2972_s16 = smov %s2433_s17  ;;  %s2973_s17 = smov %s2504_s24 }
0x2034   : > { %s2974_s18 = smov %s2493_s21  ;;  %20 = sbr.rel (!%p18_p5) target bundleno = 5 (0x5), region = 87 }
0x203b   :  { %1653 = vsyncpa [#allocation3], 1 }
0x203c   :  { %1655 = vsyncpa [#allocation3 + $0x1], 1 }
0x203d   :  { %1656 = vsyncpa [#allocation5], 1 }
0x203e   :  { %1658 = vsyncpa [#allocation5 + $0x1], 1 }

</bundles_post_ra>
